<compile_context>
chip_gen: v7x
topology: tpu7x:2x2x1
jax: 0.10.0
libtpu: 0.0.40
codegen_flags: <defaults>
</compile_context>

<pallas_src>
import functools
import math

import jax
import jax.numpy as jnp
from jax.experimental import pallas as pl
from jax.experimental.pallas import tpu as pltpu


# ----------------------------------------------------------------------------
# Small helpers
# ----------------------------------------------------------------------------
def _round_up(x, m):
    return ((x + m - 1) // m) * m


def _block_diag_w1(w1, M):
    """Expand W1 (D,H) to a block-diagonal (M*D, M*H) so all M metapaths of a
    node are projected with a single MXU matmul."""
    D, H = w1.shape
    bd = jnp.zeros((M * D, M * H), w1.dtype)
    for m in range(M):
        bd = bd.at[m * D:(m + 1) * D, m * H:(m + 1) * H].set(w1)
    return bd


def _softmax_from_scalars(vals):
    """Numerically-stable softmax over a short static list of rank-0 values."""
    mx = functools.reduce(jnp.maximum, vals)
    es = [jnp.exp(v - mx) for v in vals]
    denom = functools.reduce(lambda a, b: a + b, es)
    inv = 1.0 / denom
    return [e * inv for e in es]


# ----------------------------------------------------------------------------
# Kernel A (fused, single read of z): scores -> mean -> softmax -> weighted sum
#   z_ref: (N, M*D)   w1bd_ref: (M*D, M*H) bf16   b1bd/w2bd: (1, M*H) f32
#   out_ref: (N, D)
# ----------------------------------------------------------------------------
def _fused_kernel(z_ref, w1bd_ref, b1bd_ref, w2bd_ref, out_ref, *,
                  n_valid, M, D, H):
    zt = z_ref[...]
    h = jnp.dot(zt.astype(jnp.bfloat16), w1bd_ref[...],
                preferred_element_type=jnp.float32)              # (N, M*H) MXU
    p = jnp.tanh(h + b1bd_ref[...]) * w2bd_ref[...]              # f32 VPU/EUP
    col = jnp.sum(p, axis=0, keepdims=True)                      # (1, M*H)

    inv_n = 1.0 / float(n_valid)
    w = [jnp.sum(col[:, m * H:(m + 1) * H]) * inv_n for m in range(M)]
    beta = _softmax_from_scalars(w)                              # M scalars

    acc = zt[:, 0:D] * beta[0]
    for m in range(1, M):                                        # M small/static
        acc = acc + zt[:, m * D:(m + 1) * D] * beta[m]
    out_ref[...] = acc.astype(out_ref.dtype)


# ----------------------------------------------------------------------------
# Kernel B1 (tiled pass 1): metapath-packed projection, node-sum folded into a
# resident (1,1,M) accumulator per "chunk" (chunk = v7x TensorCore slot).
# ----------------------------------------------------------------------------
def _score_sum_kernel(z_ref, w1bd_ref, b1bd_ref, w2bd_ref, ssum_ref, *,
                      n_valid, node_tile, steps_per_chunk, M, H, mask_rows):
    c = pl.program_id(0)
    i = pl.program_id(1)

    @pl.when(i == 0)
    def _():
        ssum_ref[...] = jnp.zeros_like(ssum_ref)

    h = jnp.dot(z_ref[...].astype(jnp.bfloat16), w1bd_ref[...],
                preferred_element_type=jnp.float32)              # (nt, M*H)
    p = jnp.tanh(h + b1bd_ref[...]) * w2bd_ref[...]              # f32

    if mask_rows:
        # Zero contributions from zero-padded rows (they still see tanh(b1)).
        base = (c * steps_per_chunk + i) * node_tile
        rid = base + jax.lax.broadcasted_iota(jnp.int32, p.shape, 0)
        p = jnp.where(rid < n_valid, p, 0.0)

    col = jnp.sum(p, axis=0, keepdims=True)                      # (1, M*H)
    segs = [jnp.sum(col[:, m * H:(m + 1) * H], axis=-1, keepdims=True)
            for m in range(M)]                                   # M x (1,1)
    psum = jnp.concatenate(segs, axis=-1)                        # (1, M)
    ssum_ref[...] += psum.reshape(1, 1, M)


# ----------------------------------------------------------------------------
# Kernel B2 (tiled pass 2): beta from the tiny score sums (recomputed per step,
# M values), then the weighted sum over lane segments of the (nt, M*D) tile.
# ----------------------------------------------------------------------------
def _weighted_sum_kernel(ssum_ref, z_ref, out_ref, *, n_valid, M, D):
    tot = jnp.sum(ssum_ref[...], axis=0)                         # (1, M)
    inv_n = 1.0 / float(n_valid)
    w = [jnp.sum(tot[:, m:m + 1]) * inv_n for m in range(M)]
    beta = _softmax_from_scalars(w)                              # M scalars

    zt = z_ref[...]
    acc = zt[:, 0:D] * beta[0]
    for m in range(1, M):
        acc = acc + zt[:, m * D:(m + 1) * D] * beta[m]
    out_ref[...] = acc.astype(out_ref.dtype)


# ----------------------------------------------------------------------------
# Wrapper
# ----------------------------------------------------------------------------
def semantic_attention(z, w1, b1, w2, *, node_tile=None,
                       tile_target_bytes=2 << 20,
                       fused_vmem_budget=24 << 20,
                       force_two_pass=False):
    N, M, D = z.shape
    Dw, H = w1.shape
    assert Dw == D, "w1 must be (D, H)"
    MD, MH = M * D, M * H
    zbytes = z.dtype.itemsize

    # One-time weight packing (wrapper-side, tiny).
    w1bd = _block_diag_w1(w1.astype(jnp.float32), M).astype(jnp.bfloat16)
    b1bd = jnp.tile(jnp.reshape(b1, (1, H)).astype(jnp.float32), (1, M))
    w2bd = jnp.tile(jnp.reshape(w2, (1, H)).astype(jnp.float32), (1, M))
    z2 = z.reshape(N, MD)                 # free contiguous row-major view

    # ----- Fused single-read path (z + intermediates resident in VMEM) -------
    est_fused_vmem = (N * (2 * MD * zbytes      # z block (double-buffered)
                           + MD * 2             # bf16 cast of z
                           + 2 * MH * 4         # h / p intermediates
                           + 2 * D * zbytes)    # out block
                      + MD * MH * 2 + 2 * MH * 4)
    if (not force_two_pass) and est_fused_vmem <= fused_vmem_budget:
        kern = functools.partial(_fused_kernel, n_valid=N, M=M, D=D, H=H)
        return pl.pallas_call(
            kern,
            out_shape=jax.ShapeDtypeStruct((N, D), z.dtype),
            grid=(1,),
            in_specs=[
                pl.BlockSpec((N, MD), lambda i: (0, 0)),
                pl.BlockSpec((MD, MH), lambda i: (0, 0)),
                pl.BlockSpec((1, MH), lambda i: (0, 0)),
                pl.BlockSpec((1, MH), lambda i: (0, 0)),
            ],
            out_specs=pl.BlockSpec((N, D), lambda i: (0, 0)),
            compiler_params=pltpu.CompilerParams(
                dimension_semantics=("arbitrary",),
                vmem_limit_bytes=40 * 1024 * 1024),
            cost_estimate=pl.CostEstimate(
                flops=2 * N * MD * MH + 2 * N * MD,
                transcendentals=N * MH + M,
                bytes_accessed=N * MD * zbytes + N * D * zbytes + MD * MH * 2),
        )(z2, w1bd, b1bd, w2bd)

    # ----- Two-pass tiled path (large N) --------------------------------------
    if node_tile is None:
        node_tile = tile_target_bytes // (MD * zbytes)     # ~2 MiB input tiles
    node_tile = max(8, min(int(node_tile), 16384))
    node_tile = (node_tile // 8) * 8
    node_tile = min(node_tile, _round_up(N, 8))
    n_pad = _round_up(N, node_tile)
    steps = n_pad // node_tile
    num_chunks = 2 if (steps >= 2 and steps % 2 == 0) else 1   # v7x: 1 per TC
    steps_per_chunk = steps // num_chunks
    mask_rows = (n_pad != N)

    z2p = z2 if n_pad == N else jnp.pad(z2, ((0, n_pad - N), (0, 0)))

    # Pass 1: per-metapath score sums (resident accumulator output).
    k1 = functools.partial(
        _score_sum_kernel, n_valid=N, node_tile=node_tile,
        steps_per_chunk=steps_per_chunk, M=M, H=H, mask_rows=mask_rows)
    ssum = pl.pallas_call(
        k1,
        out_shape=jax.ShapeDtypeStruct((num_chunks, 1, M), jnp.float32),
        grid=(num_chunks, steps_per_chunk),
        in_specs=[
            pl.BlockSpec((node_tile, MD),
                         lambda c, i: (c * steps_per_chunk + i, 0)),
            pl.BlockSpec((MD, MH), lambda c, i: (0, 0)),
            pl.BlockSpec((1, MH), lambda c, i: (0, 0)),
            pl.BlockSpec((1, MH), lambda c, i: (0, 0)),
        ],
        out_specs=pl.BlockSpec((1, 1, M), lambda c, i: (c, 0, 0)),
        compiler_params=pltpu.CompilerParams(
            dimension_semantics=("parallel", "arbitrary"),
            vmem_limit_bytes=48 * 1024 * 1024),
        cost_estimate=pl.CostEstimate(
            flops=2 * n_pad * MD * MH,
            transcendentals=n_pad * MH,
            bytes_accessed=n_pad * MD * zbytes + MD * MH * 2
                           + num_chunks * M * 4),
    )(z2p, w1bd, b1bd, w2bd)

    # Pass 2: beta (softmax over M) folded into the weighted-sum kernel.
    k2 = functools.partial(_weighted_sum_kernel, n_valid=N, M=M, D=D)
    out_pad = pl.pallas_call(
        k2,
        out_shape=jax.ShapeDtypeStruct((n_pad, D), z.dtype),
        grid=(steps,),
        in_specs=[
            pl.BlockSpec((num_chunks, 1, M), lambda i: (0, 0, 0)),
            pl.BlockSpec((node_tile, MD), lambda i: (i, 0)),
        ],
        out_specs=pl.BlockSpec((node_tile, D), lambda i: (i, 0)),
        compiler_params=pltpu.CompilerParams(
            dimension_semantics=("parallel",),
            vmem_limit_bytes=48 * 1024 * 1024),
        cost_estimate=pl.CostEstimate(
            flops=2 * n_pad * MD,
            transcendentals=M,
            bytes_accessed=n_pad * MD * zbytes + n_pad * D * zbytes),
    )(ssum, z2p)

    return out_pad if n_pad == N else out_pad[:N]


# ----------------------------------------------------------------------------
# Reference (plain JAX, f32) for verification
# ----------------------------------------------------------------------------
def semantic_attention_ref(z, w1, b1, w2):
    s = jnp.tanh(z @ w1 + b1[0]) @ w2          # (N, M, 1)
    w = s.mean(0)                              # (M, 1)
    beta = jax.nn.softmax(w, axis=0)           # (M, 1)
    return (beta[None] * z).sum(1)             # (N, D)


if __name__ == "__main__":
    N, M, D, H = 256, 4, 16, 32   # nodes, metapaths, in_size, hidden_size

    key = jax.random.PRNGKey(0)
    k1, k2, k3, k4 = jax.random.split(key, 4)

    # Deterministic parameter init mimicking the PyTorch module's init scheme:
    #   Linear(D, H): xavier_uniform weight, default uniform bias
    #   Linear(H, 1, bias=False): xavier_uniform weight
    lim1 = math.sqrt(6.0 / (D + H))
    w1 = jax.random.uniform(k1, (D, H), jnp.float32, -lim1, lim1)
    bbound = 1.0 / math.sqrt(D)
    b1 = jax.random.uniform(k2, (1, H), jnp.float32, -bbound, bbound)
    lim2 = math.sqrt(6.0 / (H + 1))
    w2 = jax.random.uniform(k3, (H, 1), jnp.float32, -lim2, lim2)

    z = jax.random.normal(k4, (N, M, D), jnp.float32)

    ref = jax.block_until_ready(semantic_attention_ref(z, w1, b1, w2))

    # Path 1: fused single-read kernel (z fits in VMEM at this size).
    out_fused = jax.block_until_ready(semantic_attention(z, w1, b1, w2))
    assert out_fused.shape == (N, D)
    # bf16 MXU operands in the projection -> tolerance is loosened vs the
    # f32 reference (scores only feed a mean + softmax, so the perturbation
    # on the output is ~1e-2 absolute at these magnitudes).
    assert jnp.allclose(out_fused, ref, rtol=5e-2, atol=5e-2), "fused mismatch"

    # Path 2: two-pass tiled path (accumulator pass-1 + fused-beta pass-2),
    # forced with a small tile so the grid / accumulator / dual-chunk code runs.
    out_tiled = jax.block_until_ready(
        semantic_attention(z, w1, b1, w2, force_two_pass=True, node_tile=64))
    assert out_tiled.shape == (N, D)
    assert jnp.allclose(out_tiled, ref, rtol=5e-2, atol=5e-2), "tiled mismatch"

    print("KERNEL_OK")
</pallas_src>

<mosaic_0001>
module attributes {stable_mosaic.version = 11 : i64} {
  func.func @_fused_kernel(%arg0: i32, %arg1: memref<256x64xf32, #tpu.memory_space<vmem>>, %arg2: memref<64x128xbf16, #tpu.memory_space<vmem>>, %arg3: memref<1x128xf32, #tpu.memory_space<vmem>>, %arg4: memref<1x128xf32, #tpu.memory_space<vmem>>, %arg5: memref<256x16xf32, #tpu.memory_space<vmem>>) attributes {dimension_semantics = [#tpu.dimension_semantics<arbitrary>], iteration_bounds = array<i64: 1>, scalar_prefetch = 0 : i64, scratch_operands = 0 : i64, tpu.core_type = #tpu.core_type<tc>, window_params = [{pipeline_mode = #tpu.pipeline_mode<synchronous>, transform_indices = @transform_0, window_bounds = array<i64: 256, 64>}, {pipeline_mode = #tpu.pipeline_mode<synchronous>, transform_indices = @transform_1, window_bounds = array<i64: 64, 128>}, {pipeline_mode = #tpu.pipeline_mode<synchronous>, transform_indices = @transform_2, window_bounds = array<i64: 1, 128>}, {pipeline_mode = #tpu.pipeline_mode<synchronous>, transform_indices = @transform_3, window_bounds = array<i64: 1, 128>}, {pipeline_mode = #tpu.pipeline_mode<synchronous>, transform_indices = @transform_4, window_bounds = array<i64: 256, 16>}]} {
    %c0 = arith.constant 0 : index
    %c0_0 = arith.constant 0 : index
    %0 = vector.load %arg1[%c0, %c0_0] : memref<256x64xf32, #tpu.memory_space<vmem>>, vector<256x64xf32>
    %1 = arith.truncf %0 : vector<256x64xf32> to vector<256x64xbf16>
    %c0_1 = arith.constant 0 : index
    %c0_2 = arith.constant 0 : index
    %2 = vector.load %arg2[%c0_1, %c0_2] : memref<64x128xbf16, #tpu.memory_space<vmem>>, vector<64x128xbf16>
    %cst = arith.constant dense<0.000000e+00> : vector<256x128xf32>
    %3 = tpu.matmul %1, %2, %cst {dimension_numbers = #tpu.dot_dimension_numbers<[1], [0], [0], [1], [0, 0, 1, 1], [], []>} : vector<256x64xbf16>, vector<64x128xbf16>, vector<256x128xf32> -> vector<256x128xf32>
    %c0_3 = arith.constant 0 : index
    %c0_4 = arith.constant 0 : index
    %4 = vector.load %arg3[%c0_3, %c0_4] : memref<1x128xf32, #tpu.memory_space<vmem>>, vector<1x128xf32>
    %5 = vector.broadcast %4 : vector<1x128xf32> to vector<256x128xf32>
    %6 = arith.addf %3, %5 : vector<256x128xf32>
    %7 = math.tanh %6 : vector<256x128xf32>
    %c0_5 = arith.constant 0 : index
    %c0_6 = arith.constant 0 : index
    %8 = vector.load %arg4[%c0_5, %c0_6] : memref<1x128xf32, #tpu.memory_space<vmem>>, vector<1x128xf32>
    %9 = vector.broadcast %8 : vector<1x128xf32> to vector<256x128xf32>
    %10 = arith.mulf %7, %9 : vector<256x128xf32>
    %cst_7 = arith.constant dense<0.000000e+00> : vector<128xf32>
    %11 = vector.multi_reduction <add>, %10, %cst_7 [0] : vector<256x128xf32> to vector<128xf32>
    %12 = vector.shape_cast %11 : vector<128xf32> to vector<1x128xf32>
    %13 = vector.extract_strided_slice %12 {offsets = [0, 0], sizes = [1, 32], strides = [1, 1]} : vector<1x128xf32> to vector<1x32xf32>
    %14 = vector.shape_cast %13 : vector<1x32xf32> to vector<1x1x32xf32>
    %cst_8 = arith.constant dense<0.000000e+00> : vector<1xf32>
    %15 = vector.multi_reduction <add>, %14, %cst_8 [1, 2] : vector<1x1x32xf32> to vector<1xf32>
    %16 = vector.shape_cast %15 : vector<1xf32> to vector<1x1x1xf32>
    %17 = vector.extract %16[0, 0, 0] : f32 from vector<1x1x1xf32>
    %cst_9 = arith.constant 3.906250e-03 : f32
    %18 = arith.mulf %17, %cst_9 : f32
    %19 = vector.extract_strided_slice %12 {offsets = [0, 32], sizes = [1, 32], strides = [1, 1]} : vector<1x128xf32> to vector<1x32xf32>
    %20 = vector.shape_cast %19 : vector<1x32xf32> to vector<1x1x32xf32>
    %cst_10 = arith.constant dense<0.000000e+00> : vector<1xf32>
    %21 = vector.multi_reduction <add>, %20, %cst_10 [1, 2] : vector<1x1x32xf32> to vector<1xf32>
    %22 = vector.shape_cast %21 : vector<1xf32> to vector<1x1x1xf32>
    %23 = vector.extract %22[0, 0, 0] : f32 from vector<1x1x1xf32>
    %cst_11 = arith.constant 3.906250e-03 : f32
    %24 = arith.mulf %23, %cst_11 : f32
    %25 = vector.extract_strided_slice %12 {offsets = [0, 64], sizes = [1, 32], strides = [1, 1]} : vector<1x128xf32> to vector<1x32xf32>
    %26 = vector.shape_cast %25 : vector<1x32xf32> to vector<1x1x32xf32>
    %cst_12 = arith.constant dense<0.000000e+00> : vector<1xf32>
    %27 = vector.multi_reduction <add>, %26, %cst_12 [1, 2] : vector<1x1x32xf32> to vector<1xf32>
    %28 = vector.shape_cast %27 : vector<1xf32> to vector<1x1x1xf32>
    %29 = vector.extract %28[0, 0, 0] : f32 from vector<1x1x1xf32>
    %cst_13 = arith.constant 3.906250e-03 : f32
    %30 = arith.mulf %29, %cst_13 : f32
    %31 = vector.extract_strided_slice %12 {offsets = [0, 96], sizes = [1, 32], strides = [1, 1]} : vector<1x128xf32> to vector<1x32xf32>
    %32 = vector.shape_cast %31 : vector<1x32xf32> to vector<1x1x32xf32>
    %cst_14 = arith.constant dense<0.000000e+00> : vector<1xf32>
    %33 = vector.multi_reduction <add>, %32, %cst_14 [1, 2] : vector<1x1x32xf32> to vector<1xf32>
    %34 = vector.shape_cast %33 : vector<1xf32> to vector<1x1x1xf32>
    %35 = vector.extract %34[0, 0, 0] : f32 from vector<1x1x1xf32>
    %cst_15 = arith.constant 3.906250e-03 : f32
    %36 = arith.mulf %35, %cst_15 : f32
    %37 = arith.maximumf %18, %24 : f32
    %38 = arith.maximumf %37, %30 : f32
    %39 = arith.maximumf %38, %36 : f32
    %40 = arith.subf %18, %39 : f32
    %41 = math.exp %40 : f32
    %42 = arith.subf %24, %39 : f32
    %43 = math.exp %42 : f32
    %44 = arith.subf %30, %39 : f32
    %45 = math.exp %44 : f32
    %46 = arith.subf %36, %39 : f32
    %47 = math.exp %46 : f32
    %48 = arith.addf %41, %43 : f32
    %49 = arith.addf %48, %45 : f32
    %50 = arith.addf %49, %47 : f32
    %cst_16 = arith.constant 1.000000e+00 : f32
    %51 = arith.divf %cst_16, %50 : f32
    %52 = arith.mulf %41, %51 : f32
    %53 = arith.mulf %43, %51 : f32
    %54 = arith.mulf %45, %51 : f32
    %55 = arith.mulf %47, %51 : f32
    %56 = vector.extract_strided_slice %0 {offsets = [0, 0], sizes = [256, 16], strides = [1, 1]} : vector<256x64xf32> to vector<256x16xf32>
    %57 = vector.broadcast %52 : f32 to vector<256x16xf32>
    %58 = arith.mulf %56, %57 : vector<256x16xf32>
    %59 = vector.extract_strided_slice %0 {offsets = [0, 16], sizes = [256, 16], strides = [1, 1]} : vector<256x64xf32> to vector<256x16xf32>
    %60 = vector.broadcast %53 : f32 to vector<256x16xf32>
    %61 = arith.mulf %59, %60 : vector<256x16xf32>
    %62 = arith.addf %58, %61 : vector<256x16xf32>
    %63 = vector.extract_strided_slice %0 {offsets = [0, 32], sizes = [256, 16], strides = [1, 1]} : vector<256x64xf32> to vector<256x16xf32>
    %64 = vector.broadcast %54 : f32 to vector<256x16xf32>
    %65 = arith.mulf %63, %64 : vector<256x16xf32>
    %66 = arith.addf %62, %65 : vector<256x16xf32>
    %67 = vector.extract_strided_slice %0 {offsets = [0, 48], sizes = [256, 16], strides = [1, 1]} : vector<256x64xf32> to vector<256x16xf32>
    %68 = vector.broadcast %55 : f32 to vector<256x16xf32>
    %69 = arith.mulf %67, %68 : vector<256x16xf32>
    %70 = arith.addf %66, %69 : vector<256x16xf32>
    %c0_17 = arith.constant 0 : index
    %c0_18 = arith.constant 0 : index
    %71 = vector.load %arg5[%c0_17, %c0_18] : memref<256x16xf32, #tpu.memory_space<vmem>>, vector<256x16xf32>
    tpu.vector_store %arg5[%c0_17, %c0_18], %70 {strides = array<i32>} : memref<256x16xf32, #tpu.memory_space<vmem>>, vector<256x16xf32>,
    return
  }
  func.func @transform_0(%arg0: i32) -> (i32, i32) {
    %c0_i32 = arith.constant 0 : i32
    %c0_i32_0 = arith.constant 0 : i32
    %c0_i32_1 = arith.constant 0 : i32
    return %c0_i32, %c0_i32_0 : i32, i32
  }
  func.func @transform_1(%arg0: i32) -> (i32, i32) {
    %c0_i32 = arith.constant 0 : i32
    %c0_i32_0 = arith.constant 0 : i32
    %c0_i32_1 = arith.constant 0 : i32
    return %c0_i32, %c0_i32_0 : i32, i32
  }
  func.func @transform_2(%arg0: i32) -> (i32, i32) {
    %c0_i32 = arith.constant 0 : i32
    %c0_i32_0 = arith.constant 0 : i32
    %c0_i32_1 = arith.constant 0 : i32
    return %c0_i32, %c0_i32_0 : i32, i32
  }
  func.func @transform_3(%arg0: i32) -> (i32, i32) {
    %c0_i32 = arith.constant 0 : i32
    %c0_i32_0 = arith.constant 0 : i32
    %c0_i32_1 = arith.constant 0 : i32
    return %c0_i32, %c0_i32_0 : i32, i32
  }
  func.func @transform_4(%arg0: i32) -> (i32, i32) {
    %c0_i32 = arith.constant 0 : i32
    %c0_i32_0 = arith.constant 0 : i32
    %c0_i32_1 = arith.constant 0 : i32
    return %c0_i32, %c0_i32_0 : i32, i32
  }
}

</mosaic_0001>

<bundles_post_ra>
// kernel: tpu_custom_call.1
= control target key start
LH: loop header
LB: loop body
LE: loop exit
PB: predicated region body
PF: predicated region fallthrough
CT: control target
= control target key end

     0   :  { %vm105_vm0 = vcmask 523264   ;;  %s1384_s9 = smov 96   ;;  %s1385_s10 = smov 64   ;;  %vm423_vm1 = vcmask 253952   ;;  %vm1123_vm2 = vcmask 130048   ;;  %s2466_s1 = inlined_call_operand.vmem [shape: bf16[64,128], index: 1, kind: input, shape index: {}]   ;;  %s2467_s0 = inlined_call_operand.vmem [shape: f32[256,64], index: 0, kind: input, shape index: {}]   ;;  %s2468_s2 = inlined_call_operand.vmem [shape: f32[1,128], index: 2, kind: input, shape index: {}]   ;;  %s2469_s3 = inlined_call_operand.vmem [shape: f32[1,128], index: 3, kind: input, shape index: {}]   ;;  %s2470_s4 = inlined_call_operand.vmem [shape: f32[256,16], index: 4, kind: output, shape index: {}]  }
   0x1   :  { %v1273_v0 = vld [vmem:[%s2466_s1] sm:$0xff]   ;;  %v1274_v1 = vld [vmem:[%s2466_s1 + $0x8] sm:$0xff]   ;;  %v1275_v2 = vld [vmem:[%s2466_s1 + $0x10] sm:$0xff]  }
   0x2   :  { %1202 = vmatprep.subr.bf16.mxu0 %v1273_v0  ;;  %1242 = vmatprep.subr.bf16.mxu1 %v1273_v0  ;;  %v1425_v3 = vld [vmem:[%s2467_s0] sm:$0xff]  ;;  %v1430_v4 = vld [vmem:[%s2467_s0 + $0x8] sm:$0xff]  ;;  %v1276_v6 = vld [vmem:[%s2466_s1 + $0x18] sm:$0xff]  }
   0x3   :  { %1203 = vmatpush3.bf16.msra.mxu0 %v1273_v0  ;;  %1246 = vmatpush3.bf16.msra.mxu1 %v1273_v0  ;;  %v50_v5 = vpack.c.bf16 %v1430_v4, %v1425_v3  ;;  %v1441_v7 = vld [vmem:[%s2467_s0 + $0x80] sm:$0xff]  ;;  %v1446_v8 = vld [vmem:[%s2467_s0 + $0x88] sm:$0xff]  ;;  %v1453_v10 = vld [vmem:[%s2467_s0 + $0x10] sm:$0xff] }
   0x4   :  { %1204 = vmatprep.subr.bf16.mxu0 %v1274_v1  ;;  %1243 = vmatprep.subr.bf16.mxu1 %v1274_v1  ;;  %v58_v9 = vpack.c.bf16 %v1446_v8, %v1441_v7  ;;  %v1458_v11 = vld [vmem:[%s2467_s0 + $0x18] sm:$0xff]  ;;  %v1463_v12 = vld [vmem:[%s2467_s0 + $0x20] sm:$0xff]  ;;  %v1468_v13 = vld [vmem:[%s2467_s0 + $0x28] sm:$0xff] }
   0x5   :  { %1210 = vmatprep.mubr.msk.bf16.mxu0 %vm105_vm0, %v50_v5  ;;  %v1473_v14 = vld [vmem:[%s2467_s0 + $0x90] sm:$0xff]  ;;  %v1478_v15 = vld [vmem:[%s2467_s0 + $0x98] sm:$0xff]  ;;  %v1484_v16 = vld [vmem:[%s2467_s0 + $0xa0] sm:$0xff]  ;;  %v51_v18 = vpack.c.bf16 %v1458_v11, %v1453_v10  ;;  %v52_v19 = vpack.c.bf16 %v1468_v13, %v1463_v12 }
   0x6   :  { %1226 = vmatprep.mubr.msk.bf16.mxu1 %vm105_vm0, %v58_v9  ;;  %v1489_v17 = vld [vmem:[%s2467_s0 + $0xa8] sm:$0xff]  ;;  %v59_v20 = vpack.c.bf16 %v1478_v15, %v1473_v14  ;;  %v1504_v22 = vld [vmem:[%s2467_s0 + $0x30] sm:$0xff]  ;;  %v1509_v23 = vld [vmem:[%s2467_s0 + $0x38] sm:$0xff] }
   0x7   :  { %1205 = vmatpush3.bf16.msra.mxu0 %v1274_v1  ;;  %1247 = vmatpush3.bf16.msra.mxu1 %v1274_v1  ;;  %v60_v21 = vpack.c.bf16 %v1489_v17, %v1484_v16  ;;  %v1514_v24 = vld [vmem:[%s2467_s0 + $0x40] sm:$0xff]  ;;  %v1520_v25 = vld [vmem:[%s2467_s0 + $0x48] sm:$0xff]  ;;  %v1526_v26 = vld [vmem:[%s2467_s0 + $0xb0] sm:$0xff]  ;;  %v53_v30 = vpack.c.bf16 %v1509_v23, %v1504_v22 }
   0x8   :  { %1206 = vmatprep.subr.bf16.mxu0 %v1275_v2  ;;  %1244 = vmatprep.subr.bf16.mxu1 %v1275_v2  ;;  %v1531_v27 = vld [vmem:[%s2467_s0 + $0xb8] sm:$0xff]  ;;  %v1536_v28 = vld [vmem:[%s2467_s0 + $0xc0] sm:$0xff]  ;;  %v1541_v29 = vld [vmem:[%s2467_s0 + $0xc8] sm:$0xff]  ;;  %v54_v31 = vpack.c.bf16 %v1520_v25, %v1514_v24 }
   0x9   :  { %v61_v32 = vpack.c.bf16 %v1531_v27, %v1526_v26  ;;  %v62_v33 = vpack.c.bf16 %v1541_v29, %v1536_v28  ;;  %v1556_v34 = vld [vmem:[%s2467_s0 + $0x50] sm:$0xff]  ;;  %v1561_v35 = vld [vmem:[%s2467_s0 + $0x58] sm:$0xff]  ;;  %v1566_v36 = vld [vmem:[%s2467_s0 + $0x60] sm:$0xff] }
   0xa   :  { %v1572_v37 = vld [vmem:[%s2467_s0 + $0x68] sm:$0xff]  ;;  %v1578_v38 = vld [vmem:[%s2467_s0 + $0xd0] sm:$0xff]  ;;  %v1583_v39 = vld [vmem:[%s2467_s0 + $0xd8] sm:$0xff]  ;;  %v55_v42 = vpack.c.bf16 %v1561_v35, %v1556_v34 }
   0xb   :  { %1207 = vmatpush3.bf16.msra.mxu0 %v1275_v2  ;;  %1248 = vmatpush3.bf16.msra.mxu1 %v1275_v2  ;;  %v1588_v40 = vld [vmem:[%s2467_s0 + $0xe0] sm:$0xff]  ;;  %v1593_v41 = vld [vmem:[%s2467_s0 + $0xe8] sm:$0xff]  ;;  %v56_v43 = vpack.c.bf16 %v1572_v37, %v1566_v36  ;;  %v63_v44 = vpack.c.bf16 %v1583_v39, %v1578_v38  ;;  %v1608_v46 = vld [vmem:[%s2467_s0 + $0x70] sm:$0xff] }
   0xc   :  { %1208 = vmatprep.subr.bf16.mxu0 %v1276_v6  ;;  %1245 = vmatprep.subr.bf16.mxu1 %v1276_v6  ;;  %2477 = vst [vmem:[#allocation2_spill] sm:$0xff] %v1593_v41  ;;  %v64_v45 = vpack.c.bf16 %v1593_v41, %v1588_v40  ;;  %v1613_v47 = vld [vmem:[%s2467_s0 + $0x78] sm:$0xff]  ;;  %v1620_v48 = vld [vmem:[%s2467_s0 + $0xf0] sm:$0xff]  ;;  %v1636_v52 = vld [vmem:[%s2468_s2] ss:$0 sm:$0xff]  ;;  %s1386_s2 = smov 112  }
   0xd   :  { %2478 = vst [vmem:[#allocation3_spill] sm:$0xff] %v1620_v48  ;;  %v1625_v49 = vld [vmem:[%s2467_s0 + $0xf8] sm:$0xff]  ;;  %v57_v50 = vpack.c.bf16 %v1613_v47, %v1608_v46 }
   0xe   :  { %2479 = vst [vmem:[#allocation4_spill] sm:$0xff] %v1625_v49  ;;  %v65_v51 = vpack.c.bf16 %v1625_v49, %v1620_v48 }
   0xf   :  { %1209 = vmatpush3.bf16.msra.mxu0 %v1276_v6  ;;  %1249 = vmatpush3.bf16.msra.mxu1 %v1276_v6 }
  0x12   :  { %1211 = vmatmul.mubr.msk.bf16.vlgmr.msra.gmra.mrb[0].mxu0 %vm105_vm0, %v51_v18  ;;  %1227 = vmatmul.mubr.msk.bf16.vlgmr.msra.gmra.mrb[0].mxu1 %vm105_vm0, %v59_v20 }
  0x13   :  { %1214 = vmatprep.mubr.msk.bf16.mxu0 %vm105_vm0, %v52_v19  ;;  %1230 = vmatprep.mubr.msk.bf16.mxu1 %vm105_vm0, %v60_v21 }
  0x1a   :  { %1215 = vmatmul.mubr.msk.bf16.gmra.mrb[4].mxu0 %vm105_vm0, %v53_v30  ;;  %1231 = vmatmul.mubr.msk.bf16.gmra.mrb[4].mxu1 %vm105_vm0, %v61_v32 }
  0x1b   :  { %1218 = vmatprep.mubr.msk.bf16.mxu0 %vm105_vm0, %v54_v31  ;;  %1234 = vmatprep.mubr.msk.bf16.mxu1 %vm105_vm0, %v62_v33 }
  0x22   :  { %1219 = vmatmul.mubr.msk.bf16.gmra.mrb[8].mxu0 %vm105_vm0, %v55_v42  ;;  %1235 = vmatmul.mubr.msk.bf16.gmra.mrb[8].mxu1 %vm105_vm0, %v63_v44  ;;  %v1665_v42 = vld [vmem:[%s2469_s3] ss:$0 sm:$0xff]  ;;  %s1383_s3 = smov 32  }
  0x23   :  { %1222 = vmatprep.mubr.msk.bf16.mxu0 %vm105_vm0, %v56_v43  ;;  %1238 = vmatprep.mubr.msk.bf16.mxu1 %vm105_vm0, %v64_v45 }
  0x2a   :  { %1223 = vmatmul.mubr.msk.bf16.gmra.mrb[12].mxu0 %vm105_vm0, %v57_v50  ;;  %1239 = vmatmul.mubr.msk.bf16.gmra.mrb[12].mxu1 %vm105_vm0, %v65_v51 }
  0xe5   :  { %v1212_v53 = vpop.f32.mrb[0].mxu0  ;;  %v1639_v56 = vpop.f32.mrb[0].mxu1 }
  0xe6   :  { %v197_v54 = vadd.f32 %v1212_v53, %v1636_v52  ;;  %v188_v55 = vpop.f32.mrb[1].mxu0  ;;  %v1642_v59 = vpop.f32.mrb[1].mxu1 }
  0xe7   :  { %v189_v57 = vadd.f32 %v1636_v52, %v188_v55  ;;  %v1213_v58 = vpop.f32.mrb[2].mxu0  ;;  %v1644_v61 = vpop.f32.mrb[2].mxu1 }
  0xe8   :  { %v191_v60 = vpop.f32.mrb[3].mxu0  ;;  %v200_v62 = vadd.f32 %v1213_v58, %v1636_v52  ;;  %v1648_v0 = vpop.f32.mrb[3].mxu1 }
  0xe9   :  { %1277 = vtanh.f32 %v189_v57  ;;  %v192_v63 = vadd.f32 %v1636_v52, %v191_v60 }
  0xea   :  { %1279 = vtanh.f32 %v197_v54 }
  0xeb   :  { %1281 = vtanh.f32 %v192_v63 }
  0xec   :  { %1283 = vtanh.f32 %v200_v62 }
  0xed   :  { %v1216_v1 = vpop.f32.mrb[4].mxu0  ;;  %v1651_v6 = vpop.f32.mrb[4].mxu1 }
  0xee   :  { %v213_v2 = vadd.f32 %v1216_v1, %v1636_v52  ;;  %v204_v5 = vpop.f32.mrb[5].mxu0  ;;  %v1654_v19 = vpop.f32.mrb[5].mxu1 }
  0xef   :  { %v205_v9 = vadd.f32 %v1636_v52, %v204_v5  ;;  %v1217_v18 = vpop.f32.mrb[6].mxu0  ;;  %v1656_v21 = vpop.f32.mrb[6].mxu1 }
  0xf0   :  { %v207_v20 = vpop.f32.mrb[7].mxu0  ;;  %v216_v30 = vadd.f32 %v1217_v18, %v1636_v52  ;;  %v1660_v32 = vpop.f32.mrb[7].mxu1 }
  0xf1   :  { %1285 = vtanh.f32 %v205_v9  ;;  %v208_v31 = vadd.f32 %v1636_v52, %v207_v20 }
  0xf2   :  { %1287 = vtanh.f32 %v213_v2 }
  0xf3   :  { %v1278_v33 = vpop.eup %1277  ;;  %1289 = vtanh.f32 %v208_v31 }
  0xf4   :  { %v1280_v43 = vpop.eup %1279  ;;  %1291 = vtanh.f32 %v216_v30  ;;  %v354_v50 = vmul.f32 %v1278_v33, %v1665_v42 }
  0xf5   :  { %v1282_v44 = vpop.eup %1281  ;;  %v1220_v45 = vpop.f32.mrb[8].mxu0  ;;  %v356_v63 = vmul.f32 %v1280_v43, %v1665_v42 }
  0xf6   :  { %v355_v51 = vmul.f32 %v1282_v44, %v1665_v42  ;;  %v229_v53 = vadd.f32 %v1220_v45, %v1636_v52  ;;  %v220_v54 = vpop.f32.mrb[9].mxu0  ;;  %v1670_v55 = vpop.f32.mrb[8].mxu1 }
  0xf7   :  { %v1284_v57 = vpop.eup %1283  ;;  %v221_v58 = vadd.f32 %v1636_v52, %v220_v54  ;;  %v1221_v60 = vpop.f32.mrb[10].mxu0 }
  0xf8   :  { %v1673_v62 = vpop.f32.mrb[9].mxu1  ;;  %v386_v1 = vadd.f32 %v355_v51, %v354_v50  ;;  %v223_v2 = vpop.f32.mrb[11].mxu0  ;;  %v232_v9 = vadd.f32 %v1221_v60, %v1636_v52  ;;  %v357_v30 = vmul.f32 %v1284_v57, %v1665_v42 }
  0xf9   :  { %v1676_v5 = vpop.f32.mrb[10].mxu1  ;;  %1293 = vtanh.f32 %v221_v58  ;;  %v224_v18 = vadd.f32 %v1636_v52, %v223_v2 }
  0xfa   :  { %v1680_v20 = vpop.f32.mrb[11].mxu1  ;;  %v387_v31 = vadd.f32 %v386_v1, %v356_v63  ;;  %1295 = vtanh.f32 %v229_v53 }
  0xfb   :  { %v1286_v33 = vpop.eup %1285  ;;  %1297 = vtanh.f32 %v224_v18 }
  0xfc   :  { %v1288_v44 = vpop.eup %1287  ;;  %v358_v43 = vmul.f32 %v1286_v33, %v1665_v42  ;;  %v388_v45 = vadd.f32 %v387_v31, %v357_v30  ;;  %1299 = vtanh.f32 %v232_v9  ;;  %v253_v9 = vadd.f32 %v1636_v52, %v1642_v59 }
  0xfd   :  { %v1290_v50 = vpop.eup %1289  ;;  %v1224_v51 = vpop.f32.mrb[12].mxu0  ;;  %v360_v18 = vmul.f32 %v1288_v44, %v1665_v42 }
  0xfe   :  { %v389_v54 = vadd.f32 %v388_v45, %v358_v43  ;;  %v359_v58 = vmul.f32 %v1290_v50, %v1665_v42  ;;  %v245_v60 = vadd.f32 %v1224_v51, %v1636_v52  ;;  %v236_v2 = vpop.f32.mrb[13].mxu0  ;;  %v1686_v49 = vpop.f32.mrb[12].mxu1 }
  0xff   :  { %v1292_v57 = vpop.eup %1291  ;;  %v237_v53 = vadd.f32 %v1636_v52, %v236_v2  ;;  %v1225_v63 = vpop.f32.mrb[14].mxu0 }
 0x100   :  { %v1689_v1 = vpop.f32.mrb[13].mxu1  ;;  %v390_v30 = vadd.f32 %v389_v54, %v359_v58  ;;  %v239_v31 = vpop.f32.mrb[15].mxu0  ;;  %v248_v43 = vadd.f32 %v1225_v63, %v1636_v52  ;;  %v361_v51 = vmul.f32 %v1292_v57, %v1665_v42  ;;  %v261_v57 = vadd.f32 %v1639_v56, %v1636_v52 }
 0x101   :  { %v1694_v33 = vpop.f32.mrb[14].mxu1  ;;  %1301 = vtanh.f32 %v237_v53  ;;  %v240_v45 = vadd.f32 %v1636_v52, %v239_v31  ;;  %v256_v53 = vadd.f32 %v1636_v52, %v1648_v0 }
 0x102   :  { %v1698_v50 = vpop.f32.mrb[15].mxu1  ;;  %v391_v2 = vadd.f32 %v390_v30, %v360_v18  ;;  %1303 = vtanh.f32 %v245_v60  ;;  %v269_v30 = vadd.f32 %v1636_v52, %v1654_v19 }
 0x103   :  { %v1294_v48 = vpop.eup %1293  ;;  %1305 = vtanh.f32 %v240_v45 }
 0x104   :  { %v1296_v44 = vpop.eup %1295  ;;  %v362_v54 = vmul.f32 %v1294_v48, %v1665_v42  ;;  %v392_v58 = vadd.f32 %v391_v2, %v361_v51  ;;  %1307 = vtanh.f32 %v253_v9  ;;  %v264_v48 = vadd.f32 %v1644_v61, %v1636_v52 }
 0x105   :  { %v1298_v59 = vpop.eup %1297  ;;  %1309 = vtanh.f32 %v248_v43  ;;  %v364_v60 = vmul.f32 %v1296_v44, %v1665_v42  ;;  %v272_v44 = vadd.f32 %v1636_v52, %v1660_v32 }
 0x106   :  { %v393_v63 = vadd.f32 %v392_v58, %v362_v54  ;;  %v363_v31 = vmul.f32 %v1298_v59, %v1665_v42  ;;  %v1300_v41 = vpop.eup %1299  ;;  %1311 = vtanh.f32 %v256_v53 }
 0x107   :  { %v365_v9 = vmul.f32 %v1300_v41, %v1665_v42  ;;  %1313 = vtanh.f32 %v261_v57  ;;  %v277_v41 = vadd.f32 %v1651_v6, %v1636_v52 }
 0x108   :  { %v394_v18 = vadd.f32 %v393_v63, %v363_v31  ;;  %1315 = vtanh.f32 %v264_v48  ;;  %v280_v63 = vadd.f32 %v1656_v21, %v1636_v52  ;;  %v285_v31 = vadd.f32 %v1636_v52, %v1673_v62 }
 0x109   :  { %1317 = vtanh.f32 %v269_v30  ;;  %v288_v30 = vadd.f32 %v1636_v52, %v1680_v20  ;;  %v293_v62 = vadd.f32 %v1670_v55, %v1636_v52 }
 0x10a   :  { %v395_v0 = vadd.f32 %v394_v18, %v364_v60  ;;  %1319 = vtanh.f32 %v272_v44 }
 0x10b   :  { %v1302_v43 = vpop.eup %1301  ;;  %1321 = vtanh.f32 %v277_v41 }
 0x10c   :  { %v1304_v45 = vpop.eup %1303  ;;  %v366_v51 = vmul.f32 %v1302_v43, %v1665_v42  ;;  %v396_v2 = vadd.f32 %v395_v0, %v365_v9  ;;  %1323 = vtanh.f32 %v280_v63 }
 0x10d   :  { %v1306_v56 = vpop.eup %1305  ;;  %v368_v59 = vmul.f32 %v1304_v45, %v1665_v42  ;;  %1325 = vtanh.f32 %v285_v31 }
 0x10e   :  { %v1308_v61 = vpop.eup %1307  ;;  %v397_v54 = vadd.f32 %v396_v2, %v366_v51  ;;  %v367_v58 = vmul.f32 %v1306_v56, %v1665_v42  ;;  %v296_v2 = vadd.f32 %v1676_v5, %v1636_v52  ;;  %1327 = vtanh.f32 %v288_v30 }
 0x10f   :  { %v1310_v19 = vpop.eup %1309  ;;  %v370_v60 = vmul.f32 %v1308_v61, %v1665_v42  ;;  %v301_v56 = vadd.f32 %v1636_v52, %v1689_v1  ;;  %1329 = vtanh.f32 %v293_v62  ;;  %v309_v1 = vadd.f32 %v1686_v49, %v1636_v52 }
 0x110   :  { %v398_v53 = vadd.f32 %v397_v54, %v367_v58  ;;  %v369_v32 = vmul.f32 %v1310_v19, %v1665_v42  ;;  %v1312_v18 = vpop.eup %1311  ;;  %1331 = vtanh.f32 %v296_v2  ;;  %v304_v19 = vadd.f32 %v1636_v52, %v1698_v50 }
 0x111   :  { %v1314_v6 = vpop.eup %1313  ;;  %v371_v0 = vmul.f32 %v1312_v18, %v1665_v42  ;;  %1333 = vtanh.f32 %v301_v56 }
 0x112   :  { %v399_v57 = vadd.f32 %v398_v53, %v368_v59  ;;  %v1316_v9 = vpop.eup %1315  ;;  %v372_v45 = vmul.f32 %v1314_v6, %v1665_v42  ;;  %1335 = vtanh.f32 %v304_v19 }
 0x113   :  { %v1318_v43 = vpop.eup %1317  ;;  %v373_v20 = vmul.f32 %v1316_v9, %v1665_v42  ;;  %1337 = vtanh.f32 %v309_v1 }
 0x114   :  { %v400_v48 = vadd.f32 %v399_v57, %v369_v32  ;;  %v374_v61 = vmul.f32 %v1318_v43, %v1665_v42  ;;  %v1320_v54 = vpop.eup %1319  ;;  %v312_v32 = vadd.f32 %v1694_v33, %v1636_v52 }
 0x115   :  { %v1322_v55 = vpop.eup %1321  ;;  %v375_v59 = vmul.f32 %v1320_v54, %v1665_v42 }
 0x116   :  { %v401_v21 = vadd.f32 %v400_v48, %v370_v60  ;;  %v1324_v41 = vpop.eup %1323  ;;  %v376_v63 = vmul.f32 %v1322_v55, %v1665_v42  ;;  %1339 = vtanh.f32 %v312_v32 }
 0x117   :  { %v1326_v53 = vpop.eup %1325  ;;  %v377_v57 = vmul.f32 %v1324_v41, %v1665_v42 }
 0x118   :  { %v402_v51 = vadd.f32 %v401_v21, %v371_v0  ;;  %v378_v50 = vmul.f32 %v1326_v53, %v1665_v42  ;;  %v1328_v18 = vpop.eup %1327 }
 0x119   :  { %v1330_v6 = vpop.eup %1329  ;;  %v379_v49 = vmul.f32 %v1328_v18, %v1665_v42 }
 0x11a   :  { %v403_v44 = vadd.f32 %v402_v51, %v372_v45  ;;  %v1332_v30 = vpop.eup %1331  ;;  %v380_v0 = vmul.f32 %v1330_v6, %v1665_v42 }
 0x11b   :  { %v1334_v21 = vpop.eup %1333  ;;  %v381_v52 = vmul.f32 %v1332_v30, %v1665_v42 }
 0x11c   :  { %v404_v58 = vadd.f32 %v403_v44, %v373_v20  ;;  %v382_v62 = vmul.f32 %v1334_v21, %v1665_v42  ;;  %v1336_v45 = vpop.eup %1335 }
 0x11d   :  { %v1338_v2 = vpop.eup %1337  ;;  %v383_v20 = vmul.f32 %v1336_v45, %v1665_v42 }
 0x11e   :  { %v405_v5 = vadd.f32 %v404_v58, %v374_v61  ;;  %v384_v61 = vmul.f32 %v1338_v2, %v1665_v42 }
 0x120   :  { %v406_v31 = vadd.f32 %v405_v5, %v375_v59  ;;  %v1340_v44 = vpop.eup %1339 }
 0x121   :  { %v385_v58 = vmul.f32 %v1340_v44, %v1665_v42 }
 0x122   :  { %v407_v60 = vadd.f32 %v406_v31, %v376_v63 }
 0x124   :  { %v408_v48 = vadd.f32 %v407_v60, %v377_v57 }
 0x126   :  { %v409_v9 = vadd.f32 %v408_v48, %v378_v50 }
 0x128   :  { %v410_v43 = vadd.f32 %v409_v9, %v379_v49 }
 0x12a   :  { %v411_v33 = vadd.f32 %v410_v43, %v380_v0 }
 0x12c   :  { %v412_v51 = vadd.f32 %v411_v33, %v381_v52 }
 0x12e   :  { %v413_v56 = vadd.f32 %v412_v51, %v382_v62 }
 0x130   :  { %v414_v54 = vadd.f32 %v413_v56, %v383_v20 }
 0x132   :  { %v415_v55 = vadd.f32 %v414_v54, %v384_v61 }
 0x134   :  { %v416_v19 = vadd.f32 %v415_v55, %v385_v58 }
 0x136   :  { %v417_v41 = vrot.slane %v416_v19, 4 }
 0x138   :  { %v418_v5 = vadd.f32 %v417_v41, %v416_v19 }
 0x13a   :  { %v419_v59 = vrot.slane %v418_v5, 2 }
 0x13c   :  { %v420_v53 = vadd.f32 %v419_v59, %v418_v5 }
 0x13e   :  { %v421_v1 = vrot.slane %v420_v53, 1 }
 0x140   :  { %v422_v63 = vadd.f32 %v421_v1, %v420_v53 }
 0x142   :  { %464 = vrot.lane.b32.xlu1 %v422_v63, %s1383_s3  ;;  %436 = vrot.lane.b32.xlu0 %v422_v63, %s1384_s9  ;;  %v424_v31 = vsel %vm423_vm1, %v422_v63, 0.0 }
 0x146   :  { %450 = vrot.lane.b32.xlu0 %v422_v63, %s1385_s10 }
 0x166   :  { %425 = vadd.xlane.f32.xlu1 %v424_v31 }
 0x1b4   :  { %v465_v32 = vpop.permute.xlu1 %464  ;;  %v437_v42 = vpop.permute.xlu0 %436 }
 0x1b5   :  { %v439_v57 = vsel %vm423_vm1, %v437_v42, 0.0  ;;  %v467_v60 = vsel %vm423_vm1, %v465_v32, 0.0 }
 0x1b6   :  { %440 = vadd.xlane.f32.xlu0 %v439_v57  ;;  %468 = vadd.xlane.f32.xlu1 %v467_v60 }
 0x1b8   :  { %v451_v50 = vpop.permute.xlu0 %450 }
 0x1b9   :  { %v453_v18 = vsel %vm423_vm1, %v451_v50, 0.0 }
 0x1ba   :  { %454 = vadd.xlane.f32.xlu0 %v453_v18 }
 0x1f3   :  { %v426_v48 = vpop.xlane.xlu1 %425 }
 0x1f4   :  { %v427_v6 = vrot.slane %v426_v48, 4 }
 0x1f6   :  { %v428_v30 = vadd.f32 %v427_v6, %v426_v48 }
 0x1f8   :  { %v429_v9 = vrot.slane %v428_v30, 2 }
 0x1fa   :  { %v430_v49 = vadd.f32 %v429_v9, %v428_v30 }
 0x1fc   :  { %v431_v21 = vrot.slane %v430_v49, 1 }
 0x1fe   :  { %v432_v0 = vadd.f32 %v431_v21, %v430_v49 }
 0x200   :  { %1250 = vpush %v432_v0 }
 0x231   :  { %s1251_s11 = spop %1250 }
 0x232   :  { %s434_s14 = smul.f32 0.00390625, %s1251_s11 }
 0x243   :  { %v441_v43 = vpop.xlane.xlu0 %440  ;;  %v469_v52 = vpop.xlane.xlu1 %468 }
 0x244   :  { %v442_v33 = vrot.slane %v441_v43, 4  ;;  %v470_v62 = vrot.slane %v469_v52, 4 }
 0x246   :  { %v443_v45 = vadd.f32 %v442_v33, %v441_v43  ;;  %v471_v51 = vadd.f32 %v470_v62, %v469_v52 }
 0x247   :  { %v455_v2 = vpop.xlane.xlu0 %454 }
 0x248   :  { %v472_v56 = vrot.slane %v471_v51, 2  ;;  %v456_v20 = vrot.slane %v455_v2, 4  ;;  %v444_v44 = vrot.slane %v443_v45, 2 }
 0x24a   :  { %v457_v61 = vadd.f32 %v456_v20, %v455_v2  ;;  %v445_v54 = vadd.f32 %v444_v44, %v443_v45  ;;  %v473_v58 = vadd.f32 %v472_v56, %v471_v51 }
 0x24c   :  { %v458_v55 = vrot.slane %v457_v61, 2  ;;  %v446_v19 = vrot.slane %v445_v54, 1  ;;  %v474_v59 = vrot.slane %v473_v58, 1 }
 0x24e   :  { %v447_v41 = vadd.f32 %v446_v19, %v445_v54  ;;  %v459_v5 = vadd.f32 %v458_v55, %v457_v61  ;;  %v475_v63 = vadd.f32 %v474_v59, %v473_v58 }
 0x250   :  { %1252 = vpush %v447_v41  ;;  %v460_v53 = vrot.slane %v459_v5, 1 }
 0x252   :  { %v461_v1 = vadd.f32 %v460_v53, %v459_v5 }
 0x254   :  { %1254 = vpush %v461_v1 }
 0x255   :  { %1256 = vpush %v475_v63 }
 0x281   :  { %s1253_s12 = spop %1252 }
 0x282   :  { %s449_s13 = smul.f32 0.00390625, %s1253_s12 }
 0x284   :  { %s478_s18 = smax.f32 %s449_s13, %s434_s14 }
 0x285   :  { %s1255_s15 = spop %1254 }
 0x286   :  { %s463_s16 = smul.f32 0.00390625, %s1255_s15  ;;  %s1257_s17 = spop %1256 }
 0x287   :  { %s477_s19 = smul.f32 0.00390625, %s1257_s17 }
 0x288   :  { %s479_s20 = smax.f32 %s478_s18, %s463_s16 }
 0x289   :  { %s480_s21 = smax.f32 %s479_s20, %s477_s19 }
 0x28a   :  { %s481_s22 = ssub.f32 %s434_s14, %s480_s21 }
 0x28b   :  { %s486_s23 = ssub.f32 %s449_s13, %s480_s21 }
 0x28c   :  { %v482_v31 = vstv %s481_s22  ;;  %s491_s24 = ssub.f32 %s463_s16, %s480_s21 }
 0x28d   :  { %v483_v32 = vmul.f32 1.442695, %v482_v31  ;;  %v487_v42 = vstv %s486_s23  ;;  %s496_s25 = ssub.f32 %s477_s19, %s480_s21 }
 0x28e   :  { %v488_v57 = vmul.f32 1.442695, %v487_v42  ;;  %v492_v60 = vstv %s491_s24 }
 0x28f   :  { %1341 = vpow2.f32 %v483_v32  ;;  %v493_v50 = vmul.f32 1.442695, %v492_v60  ;;  %v497_v18 = vstv %s496_s25 }
 0x290   :  { %1343 = vpow2.f32 %v488_v57  ;;  %v498_v48 = vmul.f32 1.442695, %v497_v18 }
 0x291   :  { %1345 = vpow2.f32 %v493_v50 }
 0x292   :  { %1347 = vpow2.f32 %v498_v48 }
 0x299   :  { %v1342_v6 = vpop.eup %1341 }
 0x29a   :  { %v1344_v30 = vpop.eup %1343  ;;  %1258 = vpush %v1342_v6 }
 0x29b   :  { %v1346_v9 = vpop.eup %1345  ;;  %1260 = vpush %v1344_v30  ;;  %v2480_v30 = vld [vmem:[#allocation2_spill] sm:$0xff] }
 0x29c   :  { %v1348_v49 = vpop.eup %1347  ;;  %1262 = vpush %v1346_v9 }
 0x29d   :  { %1264 = vpush %v1348_v49  ;;  %v2481_v49 = vld [vmem:[#allocation3_spill] sm:$0xff] }
 0x2cb   :  { %s1756_s26 = spop %1258 }
 0x2cc   :  { %s1261_s27 = spop %1260 }
 0x2cd   :  { %s501_s28 = sadd.f32 %s1261_s27, %s1756_s26  ;;  %s1759_s29 = spop %1262 }
 0x2ce   :  { %s1762_s5 = spop %1264 }
 0x2cf   :  { %s502_s30 = sadd.f32 %s1759_s29, %s501_s28 }
 0x2d1   :  { %s503_s6 = sadd.f32 %s1762_s5, %s502_s30 }
 0x2d3   :  { %v504_v21 = vstv %s503_s6 }
 0x2d4   :  { %1349 = vrcp.f32 %v504_v21 }
 0x2de   :  { %v1350_v0 = vpop.eup %1349 }
 0x2df   :  { %1266 = vpush %v1350_v0  ;;  %v2482_v0 = vld [vmem:[#allocation4_spill] sm:$0xff] }
 0x310   :  { %s1765_s1 = spop %1266 }
 0x311   :  { %s508_s7 = smul.f32 %s1765_s1, %s1261_s27 }
 0x312   :  { %s509_s8 = smul.f32 %s1765_s1, %s1759_s29 }
 0x313   :  { %v1768_v43 = vstv %s508_s7  ;;  %s507_s3 = smul.f32 %s1765_s1, %s1756_s26 }
 0x314   :  { %v546_v52 = vmul.f32 %v1768_v43, %v1430_v4  ;;  %v545_v33 = vmul.f32 %v1768_v43, %v1425_v3  ;;  %v547_v62 = vmul.f32 %v1768_v43, %v1453_v10  ;;  %v548_v45 = vmul.f32 %v1768_v43, %v1458_v11  ;;  %s510_s10 = smul.f32 %s1765_s1, %s1762_s5 }
 0x315   :  { %v549_v51 = vmul.f32 %v1768_v43, %v1463_v12  ;;  %v550_v2 = vmul.f32 %v1768_v43, %v1468_v13  ;;  %v551_v56 = vmul.f32 %v1768_v43, %v1504_v22  ;;  %v552_v20 = vmul.f32 %v1768_v43, %v1509_v23 }
 0x316   :  { %611 = vrot.lane.b32.xlu1 %v546_v52, %s1386_s2  ;;  %609 = vrot.lane.b32.xlu0 %v545_v33, %s1386_s2  ;;  %v553_v44 = vmul.f32 %v1768_v43, %v1514_v24  ;;  %v554_v61 = vmul.f32 %v1768_v43, %v1520_v25  ;;  %v555_v54 = vmul.f32 %v1768_v43, %v1556_v34  ;;  %v1866_v33 = vstv %s509_s8 }
 0x317   :  { %v556_v58 = vmul.f32 %v1768_v43, %v1561_v35  ;;  %v557_v55 = vmul.f32 %v1768_v43, %v1566_v36  ;;  %v558_v19 = vmul.f32 %v1768_v43, %v1572_v37  ;;  %v559_v41 = vmul.f32 %v1768_v43, %v1608_v46 }
 0x318   :  { %v560_v5 = vmul.f32 %v1768_v43, %v1613_v47  ;;  %v561_v59 = vmul.f32 %v1768_v43, %v1441_v7  ;;  %v562_v53 = vmul.f32 %v1768_v43, %v1446_v8  ;;  %v563_v1 = vmul.f32 %v1768_v43, %v1473_v14 }
 0x319   :  { %v564_v63 = vmul.f32 %v1768_v43, %v1478_v15  ;;  %v565_v31 = vmul.f32 %v1768_v43, %v1484_v16  ;;  %v566_v32 = vmul.f32 %v1768_v43, %v1489_v17  ;;  %v567_v42 = vmul.f32 %v1768_v43, %v1526_v26 }
 0x31a   :  { %613 = vrot.lane.b32.xlu1 %v547_v62, %s1386_s2  ;;  %615 = vrot.lane.b32.xlu0 %v548_v45, %s1386_s2  ;;  %v568_v57 = vmul.f32 %v1768_v43, %v1531_v27  ;;  %v569_v60 = vmul.f32 %v1768_v43, %v1536_v28  ;;  %v570_v50 = vmul.f32 %v1768_v43, %v1541_v29 }
 0x31b   :  { %v571_v18 = vmul.f32 %v1768_v43, %v1578_v38  ;;  %v572_v48 = vmul.f32 %v1768_v43, %v1583_v39  ;;  %v573_v6 = vmul.f32 %v1768_v43, %v1588_v40  ;;  %v574_v9 = vmul.f32 %v1768_v43, %v2480_v30 }
 0x31c   :  { %v575_v21 = vmul.f32 %v1768_v43, %v2481_v49  ;;  %v576_v52 = vmul.f32 %v1768_v43, %v2482_v0  ;;  %v738_v62 = vmul.f32 %v1866_v33, %v1425_v3  ;;  %v739_v45 = vmul.f32 %v1866_v33, %v1430_v4 }
 0x31d   :  { %v741_v43 = vmul.f32 %v1866_v33, %v1458_v11 }
 0x31e   :  { %617 = vrot.lane.b32.xlu1 %v549_v51, %s1386_s2  ;;  %619 = vrot.lane.b32.xlu0 %v550_v2, %s1386_s2  ;;  %v740_v51 = vmul.f32 %v1866_v33, %v1453_v10  ;;  %v742_v2 = vmul.f32 %v1866_v33, %v1463_v12 }
 0x322   :  { %621 = vrot.lane.b32.xlu1 %v551_v56, %s1386_s2  ;;  %623 = vrot.lane.b32.xlu0 %v552_v20, %s1386_s2  ;;  %v743_v56 = vmul.f32 %v1866_v33, %v1468_v13  ;;  %v744_v20 = vmul.f32 %v1866_v33, %v1504_v22 }
 0x326   :  { %625 = vrot.lane.b32.xlu1 %v553_v44, %s1386_s2  ;;  %627 = vrot.lane.b32.xlu0 %v554_v61, %s1386_s2  ;;  %v745_v44 = vmul.f32 %v1866_v33, %v1509_v23  ;;  %v746_v61 = vmul.f32 %v1866_v33, %v1514_v24 }
 0x32a   :  { %629 = vrot.lane.b32.xlu1 %v555_v54, %s1386_s2  ;;  %631 = vrot.lane.b32.xlu0 %v556_v58, %s1386_s2  ;;  %v747_v54 = vmul.f32 %v1866_v33, %v1520_v25  ;;  %v748_v58 = vmul.f32 %v1866_v33, %v1556_v34 }
 0x32e   :  { %633 = vrot.lane.b32.xlu1 %v557_v55, %s1386_s2  ;;  %635 = vrot.lane.b32.xlu0 %v558_v19, %s1386_s2  ;;  %v749_v55 = vmul.f32 %v1866_v33, %v1561_v35  ;;  %v750_v19 = vmul.f32 %v1866_v33, %v1566_v36 }
 0x332   :  { %637 = vrot.lane.b32.xlu1 %v559_v41, %s1386_s2  ;;  %639 = vrot.lane.b32.xlu0 %v560_v5, %s1386_s2  ;;  %v751_v41 = vmul.f32 %v1866_v33, %v1572_v37  ;;  %v752_v5 = vmul.f32 %v1866_v33, %v1608_v46 }
 0x336   :  { %641 = vrot.lane.b32.xlu1 %v561_v59, %s1386_s2  ;;  %643 = vrot.lane.b32.xlu0 %v562_v53, %s1386_s2  ;;  %v753_v59 = vmul.f32 %v1866_v33, %v1613_v47  ;;  %v754_v53 = vmul.f32 %v1866_v33, %v1441_v7  ;;  %v758_v7 = vmul.f32 %v1866_v33, %v1484_v16 }
 0x337   :  { %v762_v16 = vmul.f32 %v1866_v33, %v1536_v28  ;;  %v764_v28 = vmul.f32 %v1866_v33, %v1578_v38  ;;  %v766_v38 = vmul.f32 %v1866_v33, %v1588_v40 }
 0x33a   :  { %645 = vrot.lane.b32.xlu1 %v563_v1, %s1386_s2  ;;  %647 = vrot.lane.b32.xlu0 %v564_v63, %s1386_s2  ;;  %v755_v1 = vmul.f32 %v1866_v33, %v1446_v8  ;;  %v756_v63 = vmul.f32 %v1866_v33, %v1473_v14  ;;  %v759_v8 = vmul.f32 %v1866_v33, %v1489_v17 }
 0x33b   :  { %v760_v14 = vmul.f32 %v1866_v33, %v1526_v26  ;;  %v763_v17 = vmul.f32 %v1866_v33, %v1541_v29  ;;  %v765_v29 = vmul.f32 %v1866_v33, %v1583_v39  ;;  %v767_v39 = vmul.f32 %v1866_v33, %v2480_v30 }
 0x33c   :  { %v768_v30 = vmul.f32 %v1866_v33, %v2481_v49 }
 0x33e   :  { %649 = vrot.lane.b32.xlu1 %v565_v31, %s1386_s2  ;;  %651 = vrot.lane.b32.xlu0 %v566_v32, %s1386_s2  ;;  %v757_v31 = vmul.f32 %v1866_v33, %v1478_v15  ;;  %v761_v15 = vmul.f32 %v1866_v33, %v1531_v27  ;;  %v1944_v32 = vstv %s507_s3 }
 0x33f   :  { %v513_v26 = vmul.f32 %v1944_v32, %v1430_v4  ;;  %v512_v27 = vmul.f32 %v1944_v32, %v1425_v3  ;;  %v514_v4 = vmul.f32 %v1944_v32, %v1453_v10  ;;  %v515_v3 = vmul.f32 %v1944_v32, %v1458_v11 }
 0x340   :  { %v516_v10 = vmul.f32 %v1944_v32, %v1463_v12  ;;  %v517_v11 = vmul.f32 %v1944_v32, %v1468_v13  ;;  %v518_v12 = vmul.f32 %v1944_v32, %v1504_v22  ;;  %v519_v13 = vmul.f32 %v1944_v32, %v1509_v23 }
 0x341   :  { %v520_v23 = vmul.f32 %v1944_v32, %v1514_v24 }
 0x342   :  { %653 = vrot.lane.b32.xlu1 %v567_v42, %s1386_s2  ;;  %655 = vrot.lane.b32.xlu0 %v568_v57, %s1386_s2 }
 0x346   :  { %657 = vrot.lane.b32.xlu1 %v569_v60, %s1386_s2  ;;  %659 = vrot.lane.b32.xlu0 %v570_v50, %s1386_s2 }
 0x34a   :  { %661 = vrot.lane.b32.xlu1 %v571_v18, %s1386_s2  ;;  %663 = vrot.lane.b32.xlu0 %v572_v48, %s1386_s2 }
 0x34e   :  { %665 = vrot.lane.b32.xlu1 %v573_v6, %s1386_s2  ;;  %667 = vrot.lane.b32.xlu0 %v574_v9, %s1386_s2 }
 0x352   :  { %669 = vrot.lane.b32.xlu1 %v575_v21, %s1386_s2  ;;  %671 = vrot.lane.b32.xlu0 %v576_v52, %s1386_s2  ;;  %v769_v52 = vmul.f32 %v1866_v33, %v2482_v0  ;;  %v1351_v0 = vld [vmem:[%s2467_s0] sm:$0xff] }
 0x356   :  { %802 = vrot.lane.b32.xlu1 %v738_v62, %s1384_s9  ;;  %804 = vrot.lane.b32.xlu0 %v739_v45, %s1384_s9  ;;  %v1990_v62 = vstv %s510_s10 }
 0x357   :  { %v931_v33 = vmul.f32 %v1351_v0, %v1990_v62 }
 0x35a   :  { %806 = vrot.lane.b32.xlu1 %v740_v51, %s1384_s9  ;;  %808 = vrot.lane.b32.xlu0 %v741_v43, %s1384_s9 }
 0x35e   :  { %810 = vrot.lane.b32.xlu1 %v742_v2, %s1384_s9  ;;  %812 = vrot.lane.b32.xlu0 %v743_v56, %s1384_s9  ;;  %v1352_v2 = vld [vmem:[%s2467_s0 + $0x8] sm:$0xff] }
 0x35f   :  { %v932_v56 = vmul.f32 %v1352_v2, %v1990_v62  ;;  %v1365_v2 = vld [vmem:[%s2467_s0 + $0x90] sm:$0xff] }
 0x362   :  { %814 = vrot.lane.b32.xlu1 %v744_v20, %s1384_s9  ;;  %816 = vrot.lane.b32.xlu0 %v745_v44, %s1384_s9  ;;  %v521_v44 = vmul.f32 %v1944_v32, %v1520_v25  ;;  %v522_v25 = vmul.f32 %v1944_v32, %v1556_v34 }
 0x366   :  { %818 = vrot.lane.b32.xlu1 %v746_v61, %s1384_s9  ;;  %820 = vrot.lane.b32.xlu0 %v747_v54, %s1384_s9 }
 0x36a   :  { %822 = vrot.lane.b32.xlu1 %v748_v58, %s1384_s9  ;;  %824 = vrot.lane.b32.xlu0 %v749_v55, %s1384_s9  ;;  %v1353_v58 = vld [vmem:[%s2467_s0 + $0x10] sm:$0xff] }
 0x36b   :  { %v933_v55 = vmul.f32 %v1353_v58, %v1990_v62  ;;  %v1367_v58 = vld [vmem:[%s2467_s0 + $0x60] sm:$0xff] }
 0x36e   :  { %826 = vrot.lane.b32.xlu1 %v750_v19, %s1384_s9  ;;  %828 = vrot.lane.b32.xlu0 %v751_v41, %s1384_s9  ;;  %v1354_v19 = vld [vmem:[%s2467_s0 + $0x18] sm:$0xff] }
 0x36f   :  { %v934_v41 = vmul.f32 %v1354_v19, %v1990_v62  ;;  %v1368_v19 = vld [vmem:[%s2467_s0 + $0x68] sm:$0xff] }
 0x372   :  { %830 = vrot.lane.b32.xlu1 %v752_v5, %s1384_s9  ;;  %832 = vrot.lane.b32.xlu0 %v753_v59, %s1384_s9  ;;  %v523_v59 = vmul.f32 %v1944_v32, %v1561_v35  ;;  %v524_v35 = vmul.f32 %v1944_v32, %v1566_v36 }
 0x376   :  { %834 = vrot.lane.b32.xlu1 %v754_v53, %s1384_s9  ;;  %836 = vrot.lane.b32.xlu0 %v755_v1, %s1384_s9 }
 0x37a   :  { %838 = vrot.lane.b32.xlu1 %v756_v63, %s1384_s9  ;;  %840 = vrot.lane.b32.xlu0 %v757_v31, %s1384_s9  ;;  %v1355_v63 = vld [vmem:[%s2467_s0 + $0x20] sm:$0xff] }
 0x37b   :  { %v935_v31 = vmul.f32 %v1355_v63, %v1990_v62  ;;  %v1370_v63 = vld [vmem:[%s2467_s0 + $0xa8] sm:$0xff] }
 0x37e   :  { %842 = vrot.lane.b32.xlu1 %v758_v7, %s1384_s9  ;;  %844 = vrot.lane.b32.xlu0 %v759_v8, %s1384_s9  ;;  %v1356_v7 = vld [vmem:[%s2467_s0 + $0x28] sm:$0xff] }
 0x37f   :  { %v936_v8 = vmul.f32 %v1356_v7, %v1990_v62 }
 0x382   :  { %846 = vrot.lane.b32.xlu1 %v760_v14, %s1384_s9  ;;  %848 = vrot.lane.b32.xlu0 %v761_v15, %s1384_s9  ;;  %v525_v15 = vmul.f32 %v1944_v32, %v1572_v37  ;;  %v526_v37 = vmul.f32 %v1944_v32, %v1608_v46 }
 0x386   :  { %850 = vrot.lane.b32.xlu1 %v762_v16, %s1384_s9  ;;  %852 = vrot.lane.b32.xlu0 %v763_v17, %s1384_s9 }
 0x388   :  { %v612_v42 = vpop.permute.xlu1 %611  ;;  %v610_v57 = vpop.permute.xlu0 %609 }
 0x389   :  { %v1960_v60 = vadd.f32 %v612_v42, %v513_v26  ;;  %v1962_v50 = vadd.f32 %v610_v57, %v512_v27  ;;  %v1357_v26 = vld [vmem:[%s2467_s0 + $0x30] sm:$0xff]  ;;  %v1358_v42 = vld [vmem:[%s2467_s0 + $0x38] sm:$0xff] }
 0x38a   :  { %854 = vrot.lane.b32.xlu1 %v764_v28, %s1384_s9  ;;  %856 = vrot.lane.b32.xlu0 %v765_v29, %s1384_s9  ;;  %v937_v27 = vmul.f32 %v1357_v26, %v1990_v62  ;;  %v938_v57 = vmul.f32 %v1358_v42, %v1990_v62  ;;  %v527_v29 = vmul.f32 %v1944_v32, %v1613_v47  ;;  %v1361_v47 = vld [vmem:[%s2467_s0 + $0x80] sm:$0xff]  ;;  %v1373_v42 = vld [vmem:[%s2467_s0 + $0xb0] sm:$0xff] }
 0x38c   :  { %v614_v18 = vpop.permute.xlu1 %613  ;;  %v616_v48 = vpop.permute.xlu0 %615 }
 0x38d   :  { %v1976_v6 = vadd.f32 %v614_v18, %v514_v4  ;;  %v1978_v9 = vadd.f32 %v616_v48, %v515_v3  ;;  %v1359_v18 = vld [vmem:[%s2467_s0 + $0x40] sm:$0xff] }
 0x38e   :  { %858 = vrot.lane.b32.xlu1 %v766_v38, %s1384_s9  ;;  %860 = vrot.lane.b32.xlu0 %v767_v39, %s1384_s9  ;;  %v939_v48 = vmul.f32 %v1359_v18, %v1990_v62  ;;  %v1360_v38 = vld [vmem:[%s2467_s0 + $0x48] sm:$0xff]  ;;  %v947_v18 = vmul.f32 %v1361_v47, %v1990_v62 }
 0x38f   :  { %v940_v39 = vmul.f32 %v1360_v38, %v1990_v62 }
 0x390   :  { %v618_v21 = vpop.permute.xlu1 %617  ;;  %v620_v40 = vpop.permute.xlu0 %619 }
 0x391   :  { %v1992_v45 = vadd.f32 %v618_v21, %v516_v10  ;;  %v1994_v51 = vadd.f32 %v620_v40, %v517_v11  ;;  %v528_v11 = vmul.f32 %v1361_v47, %v1944_v32  ;;  %v1362_v21 = vld [vmem:[%s2467_s0 + $0x88] sm:$0xff] }
 0x392   :  { %862 = vrot.lane.b32.xlu1 %v768_v30, %s1384_s9  ;;  %864 = vrot.lane.b32.xlu0 %v769_v52, %s1384_s9  ;;  %s1387_s9 = smov 80   ;;  %v529_v40 = vmul.f32 %v1362_v21, %v1944_v32  ;;  %v1376_v47 = vld [vmem:[%s2467_s0 + $0xc8] sm:$0xff] }
 0x394   :  { %v622_v49 = vpop.permute.xlu1 %621  ;;  %v624_v43 = vpop.permute.xlu0 %623 }
 0x395   :  { %v2010_v20 = vadd.f32 %v622_v49, %v518_v12  ;;  %v2012_v22 = vadd.f32 %v624_v43, %v519_v13  ;;  %v1363_v12 = vld [vmem:[%s2467_s0 + $0x50] sm:$0xff]  ;;  %v1364_v49 = vld [vmem:[%s2467_s0 + $0x58] sm:$0xff] }
 0x396   :  { %995 = vrot.lane.b32.xlu1 %v931_v33, %s1387_s9  ;;  %997 = vrot.lane.b32.xlu0 %v932_v56, %s1387_s9  ;;  %v941_v13 = vmul.f32 %v1363_v12, %v1990_v62  ;;  %v942_v43 = vmul.f32 %v1364_v49, %v1990_v62  ;;  %v530_v56 = vmul.f32 %v1365_v2, %v1944_v32 }
 0x397   :  { %v949_v12 = vmul.f32 %v1365_v2, %v1990_v62  ;;  %v1378_v2 = vld [vmem:[%s2467_s0 + $0xd8] sm:$0xff] }
 0x398   :  { %v626_v61 = vpop.permute.xlu1 %625  ;;  %v628_v54 = vpop.permute.xlu0 %627 }
 0x399   :  { %v2028_v5 = vadd.f32 %v626_v61, %v520_v23  ;;  %v2030_v24 = vadd.f32 %v628_v54, %v521_v44  ;;  %v1366_v23 = vld [vmem:[%s2467_s0 + $0x98] sm:$0xff] }
 0x39a   :  { %999 = vrot.lane.b32.xlu1 %v933_v55, %s1387_s9  ;;  %1001 = vrot.lane.b32.xlu0 %v934_v41, %s1387_s9  ;;  %v531_v44 = vmul.f32 %v1366_v23, %v1944_v32  ;;  %v943_v55 = vmul.f32 %v1367_v58, %v1990_v62  ;;  %v944_v41 = vmul.f32 %v1368_v19, %v1990_v62 }
 0x39c   :  { %v630_v53 = vpop.permute.xlu1 %629  ;;  %v632_v1 = vpop.permute.xlu0 %631 }
 0x39d   :  { %v2046_v14 = vadd.f32 %v630_v53, %v522_v25  ;;  %v2048_v34 = vadd.f32 %v632_v1, %v523_v59  ;;  %v1369_v53 = vld [vmem:[%s2467_s0 + $0xa0] sm:$0xff] }
 0x39e   :  { %1003 = vrot.lane.b32.xlu1 %v935_v31, %s1387_s9  ;;  %1005 = vrot.lane.b32.xlu0 %v936_v8, %s1387_s9  ;;  %v532_v1 = vmul.f32 %v1369_v53, %v1944_v32  ;;  %v533_v31 = vmul.f32 %v1370_v63, %v1944_v32  ;;  %v951_v58 = vmul.f32 %v1369_v53, %v1990_v62  ;;  %v1380_v53 = vld [vmem:[%s2467_s0 + $0xe8] sm:$0xff] }
 0x3a0   :  { %v634_v16 = vpop.permute.xlu1 %633  ;;  %v636_v17 = vpop.permute.xlu0 %635 }
 0x3a1   :  { %v2064_v28 = vadd.f32 %v634_v16, %v524_v35  ;;  %v2066_v36 = vadd.f32 %v636_v17, %v525_v15  ;;  %v1371_v35 = vld [vmem:[%s2467_s0 + $0x70] sm:$0xff]  ;;  %v1372_v16 = vld [vmem:[%s2467_s0 + $0x78] sm:$0xff] }
 0x3a2   :  { %1007 = vrot.lane.b32.xlu1 %v937_v27, %s1387_s9  ;;  %1009 = vrot.lane.b32.xlu0 %v938_v57, %s1387_s9  ;;  %v945_v15 = vmul.f32 %v1371_v35, %v1990_v62  ;;  %v946_v17 = vmul.f32 %v1372_v16, %v1990_v62  ;;  %v534_v57 = vmul.f32 %v1373_v42, %v1944_v32 }
 0x3a3   :  { %v953_v35 = vmul.f32 %v1373_v42, %v1990_v62  ;;  %v1382_v42 = vld [vmem:[%s2467_s0 + $0xf8] sm:$0xff] }
 0x3a4   :  { %v638_v4 = vpop.permute.xlu1 %637  ;;  %v640_v3 = vpop.permute.xlu0 %639 }
 0x3a5   :  { %v2082_v10 = vadd.f32 %v638_v4, %v526_v37  ;;  %v2084_v46 = vadd.f32 %v640_v3, %v527_v29  ;;  %v1374_v37 = vld [vmem:[%s2467_s0 + $0xb8] sm:$0xff] }
 0x3a6   :  { %1011 = vrot.lane.b32.xlu1 %v939_v48, %s1387_s9  ;;  %1013 = vrot.lane.b32.xlu0 %v940_v39, %s1387_s9  ;;  %v535_v29 = vmul.f32 %v1374_v37, %v1944_v32  ;;  %v948_v48 = vmul.f32 %v1362_v21, %v1990_v62  ;;  %v537_v21 = vmul.f32 %v1376_v47, %v1944_v32 }
 0x3a8   :  { %v642_v30 = vpop.permute.xlu1 %641  ;;  %v644_v52 = vpop.permute.xlu0 %643 }
 0x3a9   :  { %v2104_v0 = vadd.f32 %v642_v30, %v528_v11  ;;  %v2106_v33 = vadd.f32 %v644_v52, %v529_v40  ;;  %v1375_v11 = vld [vmem:[%s2467_s0 + $0xc0] sm:$0xff] }
 0x3aa   :  { %1015 = vrot.lane.b32.xlu1 %v941_v13, %s1387_s9  ;;  %1017 = vrot.lane.b32.xlu0 %v942_v43, %s1387_s9  ;;  %v536_v40 = vmul.f32 %v1375_v11, %v1944_v32  ;;  %v950_v13 = vmul.f32 %v1366_v23, %v1990_v62  ;;  %v539_v23 = vmul.f32 %v1378_v2, %v1944_v32 }
 0x3ac   :  { %v646_v61 = vpop.permute.xlu1 %645  ;;  %v648_v54 = vpop.permute.xlu0 %647 }
 0x3ad   :  { %v2126_v25 = vadd.f32 %v646_v61, %v530_v56  ;;  %v2128_v59 = vadd.f32 %v648_v54, %v531_v44  ;;  %v1377_v56 = vld [vmem:[%s2467_s0 + $0xd0] sm:$0xff] }
 0x3ae   :  { %1019 = vrot.lane.b32.xlu1 %v943_v55, %s1387_s9  ;;  %1021 = vrot.lane.b32.xlu0 %v944_v41, %s1387_s9  ;;  %v538_v44 = vmul.f32 %v1377_v56, %v1944_v32  ;;  %v952_v55 = vmul.f32 %v1370_v63, %v1990_v62  ;;  %v541_v63 = vmul.f32 %v1380_v53, %v1944_v32 }
 0x3b0   :  { %v650_v7 = vpop.permute.xlu1 %649  ;;  %v652_v8 = vpop.permute.xlu0 %651 }
 0x3b1   :  { %v2148_v26 = vadd.f32 %v650_v7, %v532_v1  ;;  %v2150_v27 = vadd.f32 %v652_v8, %v533_v31  ;;  %v1379_v1 = vld [vmem:[%s2467_s0 + $0xe0] sm:$0xff] }
 0x3b2   :  { %1023 = vrot.lane.b32.xlu1 %v945_v15, %s1387_s9  ;;  %1025 = vrot.lane.b32.xlu0 %v946_v17, %s1387_s9  ;;  %v540_v31 = vmul.f32 %v1379_v1, %v1944_v32  ;;  %v954_v15 = vmul.f32 %v1374_v37, %v1990_v62  ;;  %v543_v37 = vmul.f32 %v1382_v42, %v1944_v32 }
 0x3b4   :  { %v654_v4 = vpop.permute.xlu1 %653  ;;  %v656_v3 = vpop.permute.xlu0 %655 }
 0x3b5   :  { %v2164_v38 = vadd.f32 %v654_v4, %v534_v57  ;;  %v2166_v39 = vadd.f32 %v656_v3, %v535_v29  ;;  %v1381_v57 = vld [vmem:[%s2467_s0 + $0xf0] sm:$0xff] }
 0x3b6   :  { %1027 = vrot.lane.b32.xlu1 %v947_v18, %s1387_s9  ;;  %1029 = vrot.lane.b32.xlu0 %v948_v48, %s1387_s9  ;;  %v542_v29 = vmul.f32 %v1381_v57, %v1944_v32  ;;  %v955_v18 = vmul.f32 %v1375_v11, %v1990_v62  ;;  %v956_v48 = vmul.f32 %v1376_v47, %v1990_v62 }
 0x3b7   :  { %v958_v32 = vmul.f32 %v1378_v2, %v1990_v62  ;;  %v962_v2 = vmul.f32 %v1382_v42, %v1990_v62 }
 0x3b8   :  { %v658_v30 = vpop.permute.xlu1 %657  ;;  %v660_v52 = vpop.permute.xlu0 %659 }
 0x3b9   :  { %v2180_v49 = vadd.f32 %v658_v30, %v536_v40  ;;  %v2182_v43 = vadd.f32 %v660_v52, %v537_v21 }
 0x3ba   :  { %1031 = vrot.lane.b32.xlu1 %v949_v12, %s1387_s9  ;;  %1033 = vrot.lane.b32.xlu0 %v950_v13, %s1387_s9  ;;  %v957_v12 = vmul.f32 %v1377_v56, %v1990_v62  ;;  %v959_v13 = vmul.f32 %v1379_v1, %v1990_v62  ;;  %v961_v56 = vmul.f32 %v1381_v57, %v1990_v62 }
 0x3bc   :  { %v662_v61 = vpop.permute.xlu1 %661  ;;  %v664_v54 = vpop.permute.xlu0 %663 }
 0x3bd   :  { %v2196_v19 = vadd.f32 %v662_v61, %v538_v44  ;;  %v2198_v41 = vadd.f32 %v664_v54, %v539_v23  ;;  %v960_v44 = vmul.f32 %v1380_v53, %v1990_v62 }
 0x3be   :  { %1035 = vrot.lane.b32.xlu1 %v951_v58, %s1387_s9  ;;  %1037 = vrot.lane.b32.xlu0 %v952_v55, %s1387_s9 }
 0x3bf   :  { %2483 = vst [vmem:[#allocation2_spill] sm:$0xff] %v2196_v19  ;;  %2484 = vst [vmem:[#allocation3_spill] sm:$0xff] %v2198_v41 }
 0x3c0   :  { %v666_v7 = vpop.permute.xlu1 %665  ;;  %v668_v8 = vpop.permute.xlu0 %667 }
 0x3c1   :  { %v2212_v16 = vadd.f32 %v666_v7, %v540_v31  ;;  %v2214_v17 = vadd.f32 %v668_v8, %v541_v63 }
 0x3c2   :  { %1039 = vrot.lane.b32.xlu1 %v953_v35, %s1387_s9  ;;  %1041 = vrot.lane.b32.xlu0 %v954_v15, %s1387_s9 }
 0x3c3   :  { %2485 = vst [vmem:[#allocation4_spill] sm:$0xff] %v2212_v16  ;;  %2486 = vst [vmem:[#allocation5_spill] sm:$0xff] %v2214_v17 }
 0x3c4   :  { %v670_v4 = vpop.permute.xlu1 %669  ;;  %v672_v3 = vpop.permute.xlu0 %671 }
 0x3c5   :  { %v2228_v40 = vadd.f32 %v670_v4, %v542_v29  ;;  %v2230_v21 = vadd.f32 %v672_v3, %v543_v37 }
 0x3c6   :  { %1043 = vrot.lane.b32.xlu1 %v955_v18, %s1387_s9  ;;  %1045 = vrot.lane.b32.xlu0 %v956_v48, %s1387_s9 }
 0x3c7   :  { %2487 = vst [vmem:[#allocation6_spill] sm:$0xff] %v2228_v40  ;;  %2488 = vst [vmem:[#allocation7_spill] sm:$0xff] %v2230_v21 }
 0x3c8   :  { %v803_v30 = vpop.permute.xlu1 %802  ;;  %v805_v52 = vpop.permute.xlu0 %804 }
 0x3c9   :  { %v898_v21 = vadd.f32 %v803_v30, %v1962_v50  ;;  %v899_v40 = vadd.f32 %v805_v52, %v1960_v60 }
 0x3ca   :  { %1047 = vrot.lane.b32.xlu1 %v957_v12, %s1387_s9  ;;  %1049 = vrot.lane.b32.xlu0 %v958_v32, %s1387_s9 }
 0x3cc   :  { %v807_v11 = vpop.permute.xlu1 %806  ;;  %v809_v47 = vpop.permute.xlu0 %808 }
 0x3ce   :  { %1051 = vrot.lane.b32.xlu1 %v959_v13, %s1387_s9  ;;  %1053 = vrot.lane.b32.xlu0 %v960_v44, %s1387_s9 }
 0x3d0   :  { %v811_v23 = vpop.permute.xlu1 %810  ;;  %v813_v61 = vpop.permute.xlu0 %812 }
 0x3d2   :  { %1055 = vrot.lane.b32.xlu1 %v961_v56, %s1387_s9  ;;  %1057 = vrot.lane.b32.xlu0 %v962_v2, %s1387_s9 }
 0x3d4   :  { %v815_v54 = vpop.permute.xlu1 %814  ;;  %v817_v58 = vpop.permute.xlu0 %816 }
 0x3d8   :  { %v819_v55 = vpop.permute.xlu1 %818  ;;  %v821_v1 = vpop.permute.xlu0 %820 }
 0x3dc   :  { %v823_v31 = vpop.permute.xlu1 %822  ;;  %v825_v53 = vpop.permute.xlu0 %824 }
 0x3e0   :  { %v2246_v63 = vpop.permute.xlu1 %826  ;;  %v2248_v7 = vpop.permute.xlu0 %828 }
 0x3e4   :  { %v2250_v8 = vpop.permute.xlu1 %830  ;;  %v2252_v35 = vpop.permute.xlu0 %832 }
 0x3e8   :  { %v2254_v15 = vpop.permute.xlu1 %834  ;;  %v2256_v62 = vpop.permute.xlu0 %836 }
 0x3ec   :  { %v2258_v57 = vpop.permute.xlu1 %838  ;;  %v2260_v29 = vpop.permute.xlu0 %840 }
 0x3f0   :  { %v2262_v42 = vpop.permute.xlu1 %842  ;;  %v2264_v37 = vpop.permute.xlu0 %844 }
 0x3f4   :  { %v2266_v4 = vpop.permute.xlu1 %846  ;;  %v2268_v3 = vpop.permute.xlu0 %848 }
 0x3f8   :  { %v2270_v18 = vpop.permute.xlu1 %850  ;;  %v2272_v48 = vpop.permute.xlu0 %852 }
 0x3fc   :  { %v2274_v12 = vpop.permute.xlu1 %854  ;;  %v2276_v32 = vpop.permute.xlu0 %856 }
 0x3fd   :  { %2489 = vst [vmem:[#allocation8_spill] sm:$0xff] %v2274_v12  ;;  %2490 = vst [vmem:[#allocation9_spill] sm:$0xff] %v2276_v32  ;;  %v900_v12 = vadd.f32 %v807_v11, %v1976_v6  ;;  %v901_v32 = vadd.f32 %v809_v47, %v1978_v9  ;;  %v903_v6 = vadd.f32 %v813_v61, %v1994_v51 }
 0x400   :  { %v2278_v13 = vpop.permute.xlu1 %858  ;;  %v2280_v44 = vpop.permute.xlu0 %860 }
 0x404   :  { %v2282_v56 = vpop.permute.xlu1 %862  ;;  %v2284_v2 = vpop.permute.xlu0 %864 }
 0x408   :  { %v996_v17 = vpop.permute.xlu1 %995  ;;  %v998_v16 = vpop.permute.xlu0 %997 }
 0x409   :  { %v1091_v41 = vadd.f32 %v996_v17, %v898_v21  ;;  %v1092_v19 = vadd.f32 %v998_v16, %v899_v40  ;;  %v902_v16 = vadd.f32 %v811_v23, %v1992_v45  ;;  %v904_v40 = vadd.f32 %v815_v54, %v2010_v20 }
 0x40a   :  { %v905_v45 = vadd.f32 %v817_v58, %v2012_v22  ;;  %v906_v23 = vadd.f32 %v819_v55, %v2028_v5  ;;  %v907_v20 = vadd.f32 %v821_v1, %v2030_v24  ;;  %v909_v5 = vadd.f32 %v825_v53, %v2048_v34 }
 0x40b   :  { %1124 = vst.msk [vmem:[%s2470_s4] sm:$0xff] %vm1123_vm2, %v1091_v41  ;;  %1125 = vst.msk [vmem:[%s2470_s4 + $0x8] sm:$0xff] %vm1123_vm2, %v1092_v19 }
 0x40c   :  { %v1000_v60 = vpop.permute.xlu1 %999  ;;  %v1002_v50 = vpop.permute.xlu0 %1001 }
 0x40d   :  { %v1093_v30 = vadd.f32 %v1000_v60, %v900_v12  ;;  %v1094_v52 = vadd.f32 %v1002_v50, %v901_v32  ;;  %v908_v12 = vadd.f32 %v823_v31, %v2046_v14  ;;  %v910_v60 = vadd.f32 %v2246_v63, %v2064_v28 }
 0x40e   :  { %v911_v14 = vadd.f32 %v2248_v7, %v2066_v36  ;;  %v912_v28 = vadd.f32 %v2250_v8, %v2082_v10  ;;  %v913_v36 = vadd.f32 %v2252_v35, %v2084_v46  ;;  %v914_v10 = vadd.f32 %v2254_v15, %v2104_v0 }
 0x40f   :  { %1126 = vst.msk [vmem:[%s2470_s4 + $0x10] sm:$0xff] %vm1123_vm2, %v1093_v30  ;;  %1127 = vst.msk [vmem:[%s2470_s4 + $0x18] sm:$0xff] %vm1123_vm2, %v1094_v52  ;;  %v915_v46 = vadd.f32 %v2256_v62, %v2106_v33  ;;  %v916_v0 = vadd.f32 %v2258_v57, %v2126_v25  ;;  %v917_v33 = vadd.f32 %v2260_v29, %v2128_v59 }
 0x410   :  { %v1004_v9 = vpop.permute.xlu1 %1003  ;;  %v1006_v19 = vpop.permute.xlu0 %1005  ;;  %v918_v25 = vadd.f32 %v2262_v42, %v2148_v26  ;;  %v919_v59 = vadd.f32 %v2264_v37, %v2150_v27  ;;  %v920_v26 = vadd.f32 %v2266_v4, %v2164_v38  ;;  %v921_v27 = vadd.f32 %v2268_v3, %v2166_v39 }
 0x411   :  { %v1095_v41 = vadd.f32 %v1004_v9, %v902_v16  ;;  %v1096_v17 = vadd.f32 %v1006_v19, %v903_v6  ;;  %v922_v38 = vadd.f32 %v2270_v18, %v2180_v49  ;;  %v923_v39 = vadd.f32 %v2272_v48, %v2182_v43  ;;  %v2493_v18 = vld [vmem:[#allocation3_spill] sm:$0xff] }
 0x413   :  { %1128 = vst.msk [vmem:[%s2470_s4 + $0x20] sm:$0xff] %vm1123_vm2, %v1095_v41  ;;  %1129 = vst.msk [vmem:[%s2470_s4 + $0x28] sm:$0xff] %vm1123_vm2, %v1096_v17 }
 0x414   :  { %v1008_v51 = vpop.permute.xlu1 %1007  ;;  %v1010_v21 = vpop.permute.xlu0 %1009 }
 0x415   :  { %v1097_v11 = vadd.f32 %v1008_v51, %v904_v40  ;;  %v1098_v47 = vadd.f32 %v1010_v21, %v905_v45 }
 0x417   :  { %1130 = vst.msk [vmem:[%s2470_s4 + $0x30] sm:$0xff] %vm1123_vm2, %v1097_v11  ;;  %1131 = vst.msk [vmem:[%s2470_s4 + $0x38] sm:$0xff] %vm1123_vm2, %v1098_v47  ;;  %v2491_v11 = vld [vmem:[#allocation2_spill] sm:$0xff]  ;;  %v2492_v47 = vld [vmem:[#allocation8_spill] sm:$0xff] }
 0x418   :  { %v1012_v22 = vpop.permute.xlu1 %1011  ;;  %v1014_v61 = vpop.permute.xlu0 %1013  ;;  %v924_v49 = vadd.f32 %v2492_v47, %v2491_v11 }
 0x419   :  { %v1099_v54 = vadd.f32 %v1012_v22, %v906_v23  ;;  %v1100_v58 = vadd.f32 %v1014_v61, %v907_v20  ;;  %v2494_v23 = vld [vmem:[#allocation9_spill] sm:$0xff] }
 0x41a   :  { %v925_v43 = vadd.f32 %v2494_v23, %v2493_v18 }
 0x41b   :  { %1132 = vst.msk [vmem:[%s2470_s4 + $0x40] sm:$0xff] %vm1123_vm2, %v1099_v54  ;;  %1133 = vst.msk [vmem:[%s2470_s4 + $0x48] sm:$0xff] %vm1123_vm2, %v1100_v58  ;;  %v2495_v54 = vld [vmem:[#allocation4_spill] sm:$0xff] }
 0x41c   :  { %v1016_v24 = vpop.permute.xlu1 %1015  ;;  %v1018_v55 = vpop.permute.xlu0 %1017  ;;  %v926_v58 = vadd.f32 %v2278_v13, %v2495_v54 }
 0x41d   :  { %v1101_v1 = vadd.f32 %v1016_v24, %v908_v12  ;;  %v1102_v32 = vadd.f32 %v1018_v55, %v909_v5  ;;  %v2496_v12 = vld [vmem:[#allocation5_spill] sm:$0xff] }
 0x41e   :  { %v927_v5 = vadd.f32 %v2280_v44, %v2496_v12 }
 0x41f   :  { %1134 = vst.msk [vmem:[%s2470_s4 + $0x50] sm:$0xff] %vm1123_vm2, %v1101_v1  ;;  %1135 = vst.msk [vmem:[%s2470_s4 + $0x58] sm:$0xff] %vm1123_vm2, %v1102_v32 }
 0x420   :  { %v1020_v34 = vpop.permute.xlu1 %1019  ;;  %v1022_v31 = vpop.permute.xlu0 %1021 }
 0x421   :  { %v1103_v53 = vadd.f32 %v1020_v34, %v910_v60  ;;  %v1104_v50 = vadd.f32 %v1022_v31, %v911_v14  ;;  %v2497_v60 = vld [vmem:[#allocation6_spill] sm:$0xff]  ;;  %v2498_v14 = vld [vmem:[#allocation7_spill] sm:$0xff] }
 0x422   :  { %v928_v13 = vadd.f32 %v2282_v56, %v2497_v60  ;;  %v929_v44 = vadd.f32 %v2284_v2, %v2498_v14 }
 0x423   :  { %1136 = vst.msk [vmem:[%s2470_s4 + $0x60] sm:$0xff] %vm1123_vm2, %v1103_v53  ;;  %1137 = vst.msk [vmem:[%s2470_s4 + $0x68] sm:$0xff] %vm1123_vm2, %v1104_v50 }
 0x424   :  { %v1024_v63 = vpop.permute.xlu1 %1023  ;;  %v1026_v7 = vpop.permute.xlu0 %1025 }
 0x425   :  { %v1105_v30 = vadd.f32 %v1024_v63, %v912_v28  ;;  %v1106_v52 = vadd.f32 %v1026_v7, %v913_v36 }
 0x427   :  { %1138 = vst.msk [vmem:[%s2470_s4 + $0x70] sm:$0xff] %vm1123_vm2, %v1105_v30  ;;  %1139 = vst.msk [vmem:[%s2470_s4 + $0x78] sm:$0xff] %vm1123_vm2, %v1106_v52 }
 0x428   :  { %v1028_v8 = vpop.permute.xlu1 %1027  ;;  %v1030_v35 = vpop.permute.xlu0 %1029 }
 0x429   :  { %v1107_v16 = vadd.f32 %v1028_v8, %v914_v10  ;;  %v1108_v6 = vadd.f32 %v1030_v35, %v915_v46 }
 0x42b   :  { %1140 = vst.msk [vmem:[%s2470_s4 + $0x80] sm:$0xff] %vm1123_vm2, %v1107_v16  ;;  %1141 = vst.msk [vmem:[%s2470_s4 + $0x88] sm:$0xff] %vm1123_vm2, %v1108_v6 }
 0x42c   :  { %v1032_v15 = vpop.permute.xlu1 %1031  ;;  %v1034_v62 = vpop.permute.xlu0 %1033 }
 0x42d   :  { %v1109_v9 = vadd.f32 %v1032_v15, %v916_v0  ;;  %v1110_v19 = vadd.f32 %v1034_v62, %v917_v33 }
 0x42f   :  { %1142 = vst.msk [vmem:[%s2470_s4 + $0x90] sm:$0xff] %vm1123_vm2, %v1109_v9  ;;  %1143 = vst.msk [vmem:[%s2470_s4 + $0x98] sm:$0xff] %vm1123_vm2, %v1110_v19 }
 0x430   :  { %v1036_v57 = vpop.permute.xlu1 %1035  ;;  %v1038_v29 = vpop.permute.xlu0 %1037 }
 0x431   :  { %v1111_v41 = vadd.f32 %v1036_v57, %v918_v25  ;;  %v1112_v17 = vadd.f32 %v1038_v29, %v919_v59 }
 0x433   :  { %1144 = vst.msk [vmem:[%s2470_s4 + $0xa0] sm:$0xff] %vm1123_vm2, %v1111_v41  ;;  %1145 = vst.msk [vmem:[%s2470_s4 + $0xa8] sm:$0xff] %vm1123_vm2, %v1112_v17 }
 0x434   :  { %v1040_v42 = vpop.permute.xlu1 %1039  ;;  %v1042_v37 = vpop.permute.xlu0 %1041 }
 0x435   :  { %v1113_v40 = vadd.f32 %v1040_v42, %v920_v26  ;;  %v1114_v45 = vadd.f32 %v1042_v37, %v921_v27 }
 0x437   :  { %1146 = vst.msk [vmem:[%s2470_s4 + $0xb0] sm:$0xff] %vm1123_vm2, %v1113_v40  ;;  %1147 = vst.msk [vmem:[%s2470_s4 + $0xb8] sm:$0xff] %vm1123_vm2, %v1114_v45 }
 0x438   :  { %v1044_v4 = vpop.permute.xlu1 %1043  ;;  %v1046_v3 = vpop.permute.xlu0 %1045 }
 0x439   :  { %v1115_v51 = vadd.f32 %v1044_v4, %v922_v38  ;;  %v1116_v21 = vadd.f32 %v1046_v3, %v923_v39 }
 0x43b   :  { %1148 = vst.msk [vmem:[%s2470_s4 + $0xc0] sm:$0xff] %vm1123_vm2, %v1115_v51  ;;  %1149 = vst.msk [vmem:[%s2470_s4 + $0xc8] sm:$0xff] %vm1123_vm2, %v1116_v21 }
 0x43c   :  { %v1048_v48 = vpop.permute.xlu1 %1047  ;;  %v1050_v20 = vpop.permute.xlu0 %1049 }
 0x43d   :  { %v1117_v22 = vadd.f32 %v1048_v48, %v924_v49  ;;  %v1118_v61 = vadd.f32 %v1050_v20, %v925_v43 }
 0x43f   :  { %1150 = vst.msk [vmem:[%s2470_s4 + $0xd0] sm:$0xff] %vm1123_vm2, %v1117_v22  ;;  %1151 = vst.msk [vmem:[%s2470_s4 + $0xd8] sm:$0xff] %vm1123_vm2, %v1118_v61 }
 0x440   :  { %v1052_v24 = vpop.permute.xlu1 %1051  ;;  %v1054_v55 = vpop.permute.xlu0 %1053 }
 0x441   :  { %v1119_v1 = vadd.f32 %v1052_v24, %v926_v58  ;;  %v1120_v32 = vadd.f32 %v1054_v55, %v927_v5 }
 0x443   :  { %1152 = vst.msk [vmem:[%s2470_s4 + $0xe0] sm:$0xff] %vm1123_vm2, %v1119_v1  ;;  %1153 = vst.msk [vmem:[%s2470_s4 + $0xe8] sm:$0xff] %vm1123_vm2, %v1120_v32 }
 0x444   :  { %v1056_v34 = vpop.permute.xlu1 %1055  ;;  %v1058_v31 = vpop.permute.xlu0 %1057 }
 0x445   :  { %v1121_v53 = vadd.f32 %v1056_v34, %v928_v13  ;;  %v1122_v50 = vadd.f32 %v1058_v31, %v929_v44 }
 0x447   :  { %1154 = vst.msk [vmem:[%s2470_s4 + $0xf0] sm:$0xff] %vm1123_vm2, %v1121_v53  ;;  %1155 = vst.msk [vmem:[%s2470_s4 + $0xf8] sm:$0xff] %vm1123_vm2, %v1122_v50 }

</bundles_post_ra>
